<compile_context>
chip_gen: v6e
topology: v6e:2x2x1
jax: 0.10.0
libtpu: 0.0.40
codegen_flags: <defaults>
</compile_context>

<pallas_src>
import functools
import math

import numpy as np
import jax
import jax.numpy as jnp
from jax.experimental import pallas as pl
from jax.experimental.pallas import tpu as pltpu


def _make_fused_kernel(op_dim):
    O = op_dim

    def rep(x):
        # Replicate x2 (B, I2) -> (B, O*I2) so column o*I2 + j carries x2[:, j].
        # In-kernel lane concatenation (cheap), replaces the old HBM-tiled operand.
        return jnp.concatenate([x] * O, axis=-1)

    def kernel(k_ref, s_ref, m_ref, kd_ref, s11_ref, kst_ref, sst_ref,
               w12_ref, w3_ref, w4_ref, w5_ref, w6_ref, w7_ref,
               sel1_ref, sel2_ref, b1_ref, b2_ref, o_ref):
        f32 = jnp.float32

        # ---- Stage 1: four independent bilinears (layers 1-4), batched ------
        # layers 1 & 2 share lhs k_emb -> one matmul against the concatenated
        # W2 slab; all four Q blocks go through one block-diagonal SEL matmul,
        # producing a single lane-dense (B, 4*O) slab [out1|out2|out3|out4].
        p12 = jnp.dot(k_ref[...], w12_ref[...], preferred_element_type=f32)
        p3 = jnp.dot(kd_ref[...], w3_ref[...], preferred_element_type=f32)
        p4 = jnp.dot(kst_ref[...], w4_ref[...], preferred_element_type=f32)

        q = jnp.concatenate(
            [p12 * jnp.concatenate([rep(s_ref[...]), rep(m_ref[...])], axis=-1),
             p3 * rep(s11_ref[...]),
             p4 * rep(sst_ref[...])],
            axis=-1)
        s1 = jnp.dot(q, sel1_ref[...], preferred_element_type=f32) + b1_ref[...]
        out1 = s1[:, 0 * O:1 * O]
        out2 = s1[:, 1 * O:2 * O]
        out3 = s1[:, 2 * O:3 * O]
        out4 = s1[:, 3 * O:4 * O]

        # ---- Stage 2: chained bilinears (layers 5-7), shared SEL constant ---
        def bl(x1, x2, w_ref, b_row):
            p = jnp.dot(x1, w_ref[...], preferred_element_type=f32)
            qq = p * rep(x2)
            return jnp.dot(qq, sel2_ref[...], preferred_element_type=f32) + b_row

        c1 = bl(out1, out2, w5_ref, b2_ref[0:1, :])
        c2 = bl(c1, out3, w6_ref, b2_ref[1:2, :])
        c3 = bl(c2, out4, w7_ref, b2_ref[2:3, :])
        o_ref[...] = c3.astype(o_ref.dtype)

    return kernel


class BilinearFeatureModule:
    """JAX/Pallas port of the PyTorch BilinearFeatureModule (fused forward)."""

    def __init__(self, key, ip_dim1, ip_dim2, ip_dim3, op_dim):
        self.op_dim = O = op_dim

        # (in1, in2) per layer, same order as the PyTorch __init__.
        layer_dims = [
            (ip_dim1, ip_dim1),  # bilinear1
            (ip_dim1, ip_dim1),  # bilinear2
            (ip_dim2, ip_dim2),  # bilinear3
            (ip_dim3, ip_dim3),  # bilinear4
            (op_dim, op_dim),    # bilinear5
            (op_dim, op_dim),    # bilinear6
            (op_dim, op_dim),    # bilinear7
        ]
        self.params = []
        for (i1, i2) in layer_dims:
            key, kw, kb = jax.random.split(key, 3)
            bound = 1.0 / math.sqrt(i1)  # matches nn.Bilinear default init
            w = jax.random.uniform(kw, (op_dim, i1, i2), jnp.float32,
                                   minval=-bound, maxval=bound)
            b = jax.random.uniform(kb, (op_dim,), jnp.float32,
                                   minval=-bound, maxval=bound)
            self.params.append((w, b))

        # ---- precompute kernel-side constants (hoisted out of the forward) ----
        def w2(w):  # (O, I1, I2) -> (I1, O*I2) with element [i, o*I2+j] = W[o,i,j]
            _, i1, i2 = w.shape
            return jnp.transpose(w, (1, 0, 2)).reshape(i1, O * i2)

        w2s = [w2(w) for (w, _) in self.params]
        self.w2_12 = jnp.concatenate([w2s[0], w2s[1]], axis=1)   # (ip1, 2*O*ip1)
        self.w2_3, self.w2_4 = w2s[2], w2s[3]
        self.w2_5, self.w2_6, self.w2_7 = w2s[4], w2s[5], w2s[6]

        def sel(i2):  # (O*i2, O): segmented sum over j within each o block
            return np.repeat(np.eye(O, dtype=np.float32), i2, axis=0)

        # Block-diagonal selector covering all four stage-1 layers -> (B, 4*O) slab.
        blocks = [sel(ip_dim1), sel(ip_dim1), sel(ip_dim2), sel(ip_dim3)]
        rows = sum(m.shape[0] for m in blocks)
        sel_s1 = np.zeros((rows, 4 * O), np.float32)
        r = 0
        for li, m in enumerate(blocks):
            sel_s1[r:r + m.shape[0], li * O:(li + 1) * O] = m
            r += m.shape[0]
        self.sel_s1 = jnp.asarray(sel_s1)            # (2*O*ip1 + O*ip2 + O*ip3, 4*O)
        self.sel_s2 = jnp.asarray(sel(op_dim))       # (O*O, O), shared by layers 5-7

        biases = [b for (_, b) in self.params]
        self.bias_s1 = jnp.concatenate(biases[:4]).reshape(1, 4 * O)  # (1, 4*O)
        self.bias_s2 = jnp.stack(biases[4:], axis=0)                  # (3, O)

        kernel = _make_fused_kernel(O)

        def forward(*arrays):
            B = arrays[0].shape[0]
            in_specs = [pl.BlockSpec(a.shape, lambda i: (0, 0)) for a in arrays]
            return pl.pallas_call(
                kernel,
                out_shape=jax.ShapeDtypeStruct((B, O), jnp.float32),
                grid=(1,),
                in_specs=in_specs,
                out_specs=pl.BlockSpec((B, O), lambda i: (0, 0)),
                compiler_params=pltpu.CompilerParams(
                    dimension_semantics=("arbitrary",)),
            )(*arrays)

        self._forward = jax.jit(forward)

    def __call__(self, k_emb, s_emb, m_emb, kd_emb, s11_emb, k_st, s_st):
        return self._forward(
            k_emb, s_emb, m_emb, kd_emb, s11_emb, k_st, s_st,
            self.w2_12, self.w2_3, self.w2_4, self.w2_5, self.w2_6, self.w2_7,
            self.sel_s1, self.sel_s2, self.bias_s1, self.bias_s2)


# ----------------------------- pure-JAX reference -----------------------------
def _bilinear_ref(x1, x2, w, b):
    return jnp.einsum("bi,oij,bj->bo", x1, w, x2) + b[None, :]


def _forward_ref(mod, k_emb, s_emb, m_emb, kd_emb, s11_emb, k_st, s_st):
    (w1, b1), (w2, b2), (w3, b3), (w4, b4), (w5, b5), (w6, b6), (w7, b7) = mod.params
    out1 = _bilinear_ref(k_emb, s_emb, w1, b1)
    out2 = _bilinear_ref(k_emb, m_emb, w2, b2)
    out3 = _bilinear_ref(kd_emb, s11_emb, w3, b3)
    out4 = _bilinear_ref(k_st, s_st, w4, b4)
    c1 = _bilinear_ref(out1, out2, w5, b5)
    c2 = _bilinear_ref(c1, out3, w6, b6)
    return _bilinear_ref(c2, out4, w7, b7)


if __name__ == "__main__":
    B = 2
    ip_dim1, ip_dim2, ip_dim3, op_dim = 32, 24, 16, 16

    key = jax.random.PRNGKey(0)
    key, kparams = jax.random.split(key)
    module = BilinearFeatureModule(kparams, ip_dim1, ip_dim2, ip_dim3, op_dim)

    keys = jax.random.split(key, 7)
    k_emb   = jax.random.normal(keys[0], (B, ip_dim1), jnp.float32)
    s_emb   = jax.random.normal(keys[1], (B, ip_dim1), jnp.float32)
    m_emb   = jax.random.normal(keys[2], (B, ip_dim1), jnp.float32)
    kd_emb  = jax.random.normal(keys[3], (B, ip_dim2), jnp.float32)
    s11_emb = jax.random.normal(keys[4], (B, ip_dim2), jnp.float32)
    k_st    = jax.random.normal(keys[5], (B, ip_dim3), jnp.float32)
    s_st    = jax.random.normal(keys[6], (B, ip_dim3), jnp.float32)

    out = module(k_emb, s_emb, m_emb, kd_emb, s11_emb, k_st, s_st)
    out = jax.block_until_ready(out)

    ref = _forward_ref(module, k_emb, s_emb, m_emb, kd_emb, s11_emb, k_st, s_st)
    assert out.shape == (B, op_dim)
    assert jnp.allclose(out, ref, rtol=1e-3, atol=1e-3), "mismatch vs reference"

    print("KERNEL_OK")
</pallas_src>

<mosaic_0001>
module attributes {stable_mosaic.version = 11 : i64} {
  func.func @kernel(%arg0: i32, %arg1: memref<2x32xf32, #tpu.memory_space<vmem>>, %arg2: memref<2x32xf32, #tpu.memory_space<vmem>>, %arg3: memref<2x32xf32, #tpu.memory_space<vmem>>, %arg4: memref<2x24xf32, #tpu.memory_space<vmem>>, %arg5: memref<2x24xf32, #tpu.memory_space<vmem>>, %arg6: memref<2x16xf32, #tpu.memory_space<vmem>>, %arg7: memref<2x16xf32, #tpu.memory_space<vmem>>, %arg8: memref<32x1024xf32, #tpu.memory_space<vmem>>, %arg9: memref<24x384xf32, #tpu.memory_space<vmem>>, %arg10: memref<16x256xf32, #tpu.memory_space<vmem>>, %arg11: memref<16x256xf32, #tpu.memory_space<vmem>>, %arg12: memref<16x256xf32, #tpu.memory_space<vmem>>, %arg13: memref<16x256xf32, #tpu.memory_space<vmem>>, %arg14: memref<1664x64xf32, #tpu.memory_space<vmem>>, %arg15: memref<256x16xf32, #tpu.memory_space<vmem>>, %arg16: memref<1x64xf32, #tpu.memory_space<vmem>>, %arg17: memref<3x16xf32, #tpu.memory_space<vmem>>, %arg18: memref<2x16xf32, #tpu.memory_space<vmem>>) attributes {dimension_semantics = [#tpu.dimension_semantics<arbitrary>], iteration_bounds = array<i64: 1>, scalar_prefetch = 0 : i64, scratch_operands = 0 : i64, tpu.core_type = #tpu.core_type<tc>, window_params = [{pipeline_mode = #tpu.pipeline_mode<synchronous>, transform_indices = @transform_0, window_bounds = array<i64: 2, 32>}, {pipeline_mode = #tpu.pipeline_mode<synchronous>, transform_indices = @transform_1, window_bounds = array<i64: 2, 32>}, {pipeline_mode = #tpu.pipeline_mode<synchronous>, transform_indices = @transform_2, window_bounds = array<i64: 2, 32>}, {pipeline_mode = #tpu.pipeline_mode<synchronous>, transform_indices = @transform_3, window_bounds = array<i64: 2, 24>}, {pipeline_mode = #tpu.pipeline_mode<synchronous>, transform_indices = @transform_4, window_bounds = array<i64: 2, 24>}, {pipeline_mode = #tpu.pipeline_mode<synchronous>, transform_indices = @transform_5, window_bounds = array<i64: 2, 16>}, {pipeline_mode = #tpu.pipeline_mode<synchronous>, transform_indices = @transform_6, window_bounds = array<i64: 2, 16>}, {pipeline_mode = #tpu.pipeline_mode<synchronous>, transform_indices = @transform_7, window_bounds = array<i64: 32, 1024>}, {pipeline_mode = #tpu.pipeline_mode<synchronous>, transform_indices = @transform_8, window_bounds = array<i64: 24, 384>}, {pipeline_mode = #tpu.pipeline_mode<synchronous>, transform_indices = @transform_9, window_bounds = array<i64: 16, 256>}, {pipeline_mode = #tpu.pipeline_mode<synchronous>, transform_indices = @transform_10, window_bounds = array<i64: 16, 256>}, {pipeline_mode = #tpu.pipeline_mode<synchronous>, transform_indices = @transform_11, window_bounds = array<i64: 16, 256>}, {pipeline_mode = #tpu.pipeline_mode<synchronous>, transform_indices = @transform_12, window_bounds = array<i64: 16, 256>}, {pipeline_mode = #tpu.pipeline_mode<synchronous>, transform_indices = @transform_13, window_bounds = array<i64: 1664, 64>}, {pipeline_mode = #tpu.pipeline_mode<synchronous>, transform_indices = @transform_14, window_bounds = array<i64: 256, 16>}, {pipeline_mode = #tpu.pipeline_mode<synchronous>, transform_indices = @transform_15, window_bounds = array<i64: 1, 64>}, {pipeline_mode = #tpu.pipeline_mode<synchronous>, transform_indices = @transform_16, window_bounds = array<i64: 3, 16>}, {pipeline_mode = #tpu.pipeline_mode<synchronous>, transform_indices = @transform_17, window_bounds = array<i64: 2, 16>}]} {
    %c0 = arith.constant 0 : index
    %c0_0 = arith.constant 0 : index
    %0 = vector.load %arg1[%c0, %c0_0] : memref<2x32xf32, #tpu.memory_space<vmem>>, vector<2x32xf32>
    %c0_1 = arith.constant 0 : index
    %c0_2 = arith.constant 0 : index
    %1 = vector.load %arg8[%c0_1, %c0_2] : memref<32x1024xf32, #tpu.memory_space<vmem>>, vector<32x1024xf32>
    %cst = arith.constant dense<0.000000e+00> : vector<2x1024xf32>
    %2 = tpu.matmul %0, %1, %cst {dimension_numbers = #tpu.dot_dimension_numbers<[1], [0], [0], [1], [0, 0, 1, 1], [], []>} : vector<2x32xf32>, vector<32x1024xf32>, vector<2x1024xf32> -> vector<2x1024xf32>
    %c0_3 = arith.constant 0 : index
    %c0_4 = arith.constant 0 : index
    %3 = vector.load %arg4[%c0_3, %c0_4] : memref<2x24xf32, #tpu.memory_space<vmem>>, vector<2x24xf32>
    %c0_5 = arith.constant 0 : index
    %c0_6 = arith.constant 0 : index
    %4 = vector.load %arg9[%c0_5, %c0_6] : memref<24x384xf32, #tpu.memory_space<vmem>>, vector<24x384xf32>
    %cst_7 = arith.constant dense<0.000000e+00> : vector<2x384xf32>
    %5 = tpu.matmul %3, %4, %cst_7 {dimension_numbers = #tpu.dot_dimension_numbers<[1], [0], [0], [1], [0, 0, 1, 1], [], []>} : vector<2x24xf32>, vector<24x384xf32>, vector<2x384xf32> -> vector<2x384xf32>
    %c0_8 = arith.constant 0 : index
    %c0_9 = arith.constant 0 : index
    %6 = vector.load %arg6[%c0_8, %c0_9] : memref<2x16xf32, #tpu.memory_space<vmem>>, vector<2x16xf32>
    %c0_10 = arith.constant 0 : index
    %c0_11 = arith.constant 0 : index
    %7 = vector.load %arg10[%c0_10, %c0_11] : memref<16x256xf32, #tpu.memory_space<vmem>>, vector<16x256xf32>
    %cst_12 = arith.constant dense<0.000000e+00> : vector<2x256xf32>
    %8 = tpu.matmul %6, %7, %cst_12 {dimension_numbers = #tpu.dot_dimension_numbers<[1], [0], [0], [1], [0, 0, 1, 1], [], []>} : vector<2x16xf32>, vector<16x256xf32>, vector<2x256xf32> -> vector<2x256xf32>
    %c0_13 = arith.constant 0 : index
    %c0_14 = arith.constant 0 : index
    %9 = vector.load %arg2[%c0_13, %c0_14] : memref<2x32xf32, #tpu.memory_space<vmem>>, vector<2x32xf32>
    %10 = tpu.concatenate %9, %9, %9, %9, %9, %9, %9, %9, %9, %9, %9, %9, %9, %9, %9, %9 in 1 : vector<2x32xf32>, vector<2x32xf32>, vector<2x32xf32>, vector<2x32xf32>, vector<2x32xf32>, vector<2x32xf32>, vector<2x32xf32>, vector<2x32xf32>, vector<2x32xf32>, vector<2x32xf32>, vector<2x32xf32>, vector<2x32xf32>, vector<2x32xf32>, vector<2x32xf32>, vector<2x32xf32>, vector<2x32xf32> -> vector<2x512xf32>
    %c0_15 = arith.constant 0 : index
    %c0_16 = arith.constant 0 : index
    %11 = vector.load %arg3[%c0_15, %c0_16] : memref<2x32xf32, #tpu.memory_space<vmem>>, vector<2x32xf32>
    %12 = tpu.concatenate %11, %11, %11, %11, %11, %11, %11, %11, %11, %11, %11, %11, %11, %11, %11, %11 in 1 : vector<2x32xf32>, vector<2x32xf32>, vector<2x32xf32>, vector<2x32xf32>, vector<2x32xf32>, vector<2x32xf32>, vector<2x32xf32>, vector<2x32xf32>, vector<2x32xf32>, vector<2x32xf32>, vector<2x32xf32>, vector<2x32xf32>, vector<2x32xf32>, vector<2x32xf32>, vector<2x32xf32>, vector<2x32xf32> -> vector<2x512xf32>
    %13 = tpu.concatenate %10, %12 in 1 : vector<2x512xf32>, vector<2x512xf32> -> vector<2x1024xf32>
    %14 = arith.mulf %2, %13 : vector<2x1024xf32>
    %c0_17 = arith.constant 0 : index
    %c0_18 = arith.constant 0 : index
    %15 = vector.load %arg5[%c0_17, %c0_18] : memref<2x24xf32, #tpu.memory_space<vmem>>, vector<2x24xf32>
    %16 = tpu.concatenate %15, %15, %15, %15, %15, %15, %15, %15, %15, %15, %15, %15, %15, %15, %15, %15 in 1 : vector<2x24xf32>, vector<2x24xf32>, vector<2x24xf32>, vector<2x24xf32>, vector<2x24xf32>, vector<2x24xf32>, vector<2x24xf32>, vector<2x24xf32>, vector<2x24xf32>, vector<2x24xf32>, vector<2x24xf32>, vector<2x24xf32>, vector<2x24xf32>, vector<2x24xf32>, vector<2x24xf32>, vector<2x24xf32> -> vector<2x384xf32>
    %17 = arith.mulf %5, %16 : vector<2x384xf32>
    %c0_19 = arith.constant 0 : index
    %c0_20 = arith.constant 0 : index
    %18 = vector.load %arg7[%c0_19, %c0_20] : memref<2x16xf32, #tpu.memory_space<vmem>>, vector<2x16xf32>
    %19 = tpu.concatenate %18, %18, %18, %18, %18, %18, %18, %18, %18, %18, %18, %18, %18, %18, %18, %18 in 1 : vector<2x16xf32>, vector<2x16xf32>, vector<2x16xf32>, vector<2x16xf32>, vector<2x16xf32>, vector<2x16xf32>, vector<2x16xf32>, vector<2x16xf32>, vector<2x16xf32>, vector<2x16xf32>, vector<2x16xf32>, vector<2x16xf32>, vector<2x16xf32>, vector<2x16xf32>, vector<2x16xf32>, vector<2x16xf32> -> vector<2x256xf32>
    %20 = arith.mulf %8, %19 : vector<2x256xf32>
    %21 = tpu.concatenate %14, %17, %20 in 1 : vector<2x1024xf32>, vector<2x384xf32>, vector<2x256xf32> -> vector<2x1664xf32>
    %c0_21 = arith.constant 0 : index
    %c0_22 = arith.constant 0 : index
    %22 = vector.load %arg14[%c0_21, %c0_22] : memref<1664x64xf32, #tpu.memory_space<vmem>>, vector<1664x64xf32>
    %cst_23 = arith.constant dense<0.000000e+00> : vector<2x64xf32>
    %23 = tpu.matmul %21, %22, %cst_23 {dimension_numbers = #tpu.dot_dimension_numbers<[1], [0], [0], [1], [0, 0, 1, 1], [], []>} : vector<2x1664xf32>, vector<1664x64xf32>, vector<2x64xf32> -> vector<2x64xf32>
    %c0_24 = arith.constant 0 : index
    %c0_25 = arith.constant 0 : index
    %24 = vector.load %arg16[%c0_24, %c0_25] : memref<1x64xf32, #tpu.memory_space<vmem>>, vector<1x64xf32>
    %25 = vector.broadcast %24 : vector<1x64xf32> to vector<2x64xf32>
    %26 = arith.addf %23, %25 : vector<2x64xf32>
    %27 = vector.extract_strided_slice %26 {offsets = [0, 0], sizes = [2, 16], strides = [1, 1]} : vector<2x64xf32> to vector<2x16xf32>
    %28 = vector.extract_strided_slice %26 {offsets = [0, 16], sizes = [2, 16], strides = [1, 1]} : vector<2x64xf32> to vector<2x16xf32>
    %29 = vector.extract_strided_slice %26 {offsets = [0, 32], sizes = [2, 16], strides = [1, 1]} : vector<2x64xf32> to vector<2x16xf32>
    %30 = vector.extract_strided_slice %26 {offsets = [0, 48], sizes = [2, 16], strides = [1, 1]} : vector<2x64xf32> to vector<2x16xf32>
    %c0_26 = arith.constant 0 : index
    %c0_27 = arith.constant 0 : index
    %31 = vector.load %arg17[%c0_26, %c0_27] : memref<3x16xf32, #tpu.memory_space<vmem>>, vector<1x16xf32>
    %c0_28 = arith.constant 0 : index
    %c0_29 = arith.constant 0 : index
    %32 = vector.load %arg11[%c0_28, %c0_29] : memref<16x256xf32, #tpu.memory_space<vmem>>, vector<16x256xf32>
    %cst_30 = arith.constant dense<0.000000e+00> : vector<2x256xf32>
    %33 = tpu.matmul %27, %32, %cst_30 {dimension_numbers = #tpu.dot_dimension_numbers<[1], [0], [0], [1], [0, 0, 1, 1], [], []>} : vector<2x16xf32>, vector<16x256xf32>, vector<2x256xf32> -> vector<2x256xf32>
    %34 = tpu.concatenate %28, %28, %28, %28, %28, %28, %28, %28, %28, %28, %28, %28, %28, %28, %28, %28 in 1 : vector<2x16xf32>, vector<2x16xf32>, vector<2x16xf32>, vector<2x16xf32>, vector<2x16xf32>, vector<2x16xf32>, vector<2x16xf32>, vector<2x16xf32>, vector<2x16xf32>, vector<2x16xf32>, vector<2x16xf32>, vector<2x16xf32>, vector<2x16xf32>, vector<2x16xf32>, vector<2x16xf32>, vector<2x16xf32> -> vector<2x256xf32>
    %35 = arith.mulf %33, %34 : vector<2x256xf32>
    %c0_31 = arith.constant 0 : index
    %c0_32 = arith.constant 0 : index
    %36 = vector.load %arg15[%c0_31, %c0_32] : memref<256x16xf32, #tpu.memory_space<vmem>>, vector<256x16xf32>
    %cst_33 = arith.constant dense<0.000000e+00> : vector<2x16xf32>
    %37 = tpu.matmul %35, %36, %cst_33 {dimension_numbers = #tpu.dot_dimension_numbers<[1], [0], [0], [1], [0, 0, 1, 1], [], []>} : vector<2x256xf32>, vector<256x16xf32>, vector<2x16xf32> -> vector<2x16xf32>
    %38 = vector.broadcast %31 : vector<1x16xf32> to vector<2x16xf32>
    %39 = arith.addf %37, %38 : vector<2x16xf32>
    %c1 = arith.constant 1 : index
    %c0_34 = arith.constant 0 : index
    %40 = vector.load %arg17[%c1, %c0_34] : memref<3x16xf32, #tpu.memory_space<vmem>>, vector<1x16xf32>
    %c0_35 = arith.constant 0 : index
    %c0_36 = arith.constant 0 : index
    %41 = vector.load %arg12[%c0_35, %c0_36] : memref<16x256xf32, #tpu.memory_space<vmem>>, vector<16x256xf32>
    %cst_37 = arith.constant dense<0.000000e+00> : vector<2x256xf32>
    %42 = tpu.matmul %39, %41, %cst_37 {dimension_numbers = #tpu.dot_dimension_numbers<[1], [0], [0], [1], [0, 0, 1, 1], [], []>} : vector<2x16xf32>, vector<16x256xf32>, vector<2x256xf32> -> vector<2x256xf32>
    %43 = tpu.concatenate %29, %29, %29, %29, %29, %29, %29, %29, %29, %29, %29, %29, %29, %29, %29, %29 in 1 : vector<2x16xf32>, vector<2x16xf32>, vector<2x16xf32>, vector<2x16xf32>, vector<2x16xf32>, vector<2x16xf32>, vector<2x16xf32>, vector<2x16xf32>, vector<2x16xf32>, vector<2x16xf32>, vector<2x16xf32>, vector<2x16xf32>, vector<2x16xf32>, vector<2x16xf32>, vector<2x16xf32>, vector<2x16xf32> -> vector<2x256xf32>
    %44 = arith.mulf %42, %43 : vector<2x256xf32>
    %c0_38 = arith.constant 0 : index
    %c0_39 = arith.constant 0 : index
    %45 = vector.load %arg15[%c0_38, %c0_39] : memref<256x16xf32, #tpu.memory_space<vmem>>, vector<256x16xf32>
    %cst_40 = arith.constant dense<0.000000e+00> : vector<2x16xf32>
    %46 = tpu.matmul %44, %45, %cst_40 {dimension_numbers = #tpu.dot_dimension_numbers<[1], [0], [0], [1], [0, 0, 1, 1], [], []>} : vector<2x256xf32>, vector<256x16xf32>, vector<2x16xf32> -> vector<2x16xf32>
    %47 = vector.broadcast %40 : vector<1x16xf32> to vector<2x16xf32>
    %48 = arith.addf %46, %47 : vector<2x16xf32>
    %c2 = arith.constant 2 : index
    %c0_41 = arith.constant 0 : index
    %49 = vector.load %arg17[%c2, %c0_41] : memref<3x16xf32, #tpu.memory_space<vmem>>, vector<1x16xf32>
    %c0_42 = arith.constant 0 : index
    %c0_43 = arith.constant 0 : index
    %50 = vector.load %arg13[%c0_42, %c0_43] : memref<16x256xf32, #tpu.memory_space<vmem>>, vector<16x256xf32>
    %cst_44 = arith.constant dense<0.000000e+00> : vector<2x256xf32>
    %51 = tpu.matmul %48, %50, %cst_44 {dimension_numbers = #tpu.dot_dimension_numbers<[1], [0], [0], [1], [0, 0, 1, 1], [], []>} : vector<2x16xf32>, vector<16x256xf32>, vector<2x256xf32> -> vector<2x256xf32>
    %52 = tpu.concatenate %30, %30, %30, %30, %30, %30, %30, %30, %30, %30, %30, %30, %30, %30, %30, %30 in 1 : vector<2x16xf32>, vector<2x16xf32>, vector<2x16xf32>, vector<2x16xf32>, vector<2x16xf32>, vector<2x16xf32>, vector<2x16xf32>, vector<2x16xf32>, vector<2x16xf32>, vector<2x16xf32>, vector<2x16xf32>, vector<2x16xf32>, vector<2x16xf32>, vector<2x16xf32>, vector<2x16xf32>, vector<2x16xf32> -> vector<2x256xf32>
    %53 = arith.mulf %51, %52 : vector<2x256xf32>
    %c0_45 = arith.constant 0 : index
    %c0_46 = arith.constant 0 : index
    %54 = vector.load %arg15[%c0_45, %c0_46] : memref<256x16xf32, #tpu.memory_space<vmem>>, vector<256x16xf32>
    %cst_47 = arith.constant dense<0.000000e+00> : vector<2x16xf32>
    %55 = tpu.matmul %53, %54, %cst_47 {dimension_numbers = #tpu.dot_dimension_numbers<[1], [0], [0], [1], [0, 0, 1, 1], [], []>} : vector<2x256xf32>, vector<256x16xf32>, vector<2x16xf32> -> vector<2x16xf32>
    %56 = vector.broadcast %49 : vector<1x16xf32> to vector<2x16xf32>
    %57 = arith.addf %55, %56 : vector<2x16xf32>
    %c0_48 = arith.constant 0 : index
    %c0_49 = arith.constant 0 : index
    %58 = vector.load %arg18[%c0_48, %c0_49] : memref<2x16xf32, #tpu.memory_space<vmem>>, vector<2x16xf32>
    tpu.vector_store %arg18[%c0_48, %c0_49], %57 {strides = array<i32>} : memref<2x16xf32, #tpu.memory_space<vmem>>, vector<2x16xf32>,
    return
  }
  func.func @transform_0(%arg0: i32) -> (i32, i32) {
    %c0_i32 = arith.constant 0 : i32
    %c0_i32_0 = arith.constant 0 : i32
    %c0_i32_1 = arith.constant 0 : i32
    return %c0_i32, %c0_i32_0 : i32, i32
  }
  func.func @transform_1(%arg0: i32) -> (i32, i32) {
    %c0_i32 = arith.constant 0 : i32
    %c0_i32_0 = arith.constant 0 : i32
    %c0_i32_1 = arith.constant 0 : i32
    return %c0_i32, %c0_i32_0 : i32, i32
  }
  func.func @transform_2(%arg0: i32) -> (i32, i32) {
    %c0_i32 = arith.constant 0 : i32
    %c0_i32_0 = arith.constant 0 : i32
    %c0_i32_1 = arith.constant 0 : i32
    return %c0_i32, %c0_i32_0 : i32, i32
  }
  func.func @transform_3(%arg0: i32) -> (i32, i32) {
    %c0_i32 = arith.constant 0 : i32
    %c0_i32_0 = arith.constant 0 : i32
    %c0_i32_1 = arith.constant 0 : i32
    return %c0_i32, %c0_i32_0 : i32, i32
  }
  func.func @transform_4(%arg0: i32) -> (i32, i32) {
    %c0_i32 = arith.constant 0 : i32
    %c0_i32_0 = arith.constant 0 : i32
    %c0_i32_1 = arith.constant 0 : i32
    return %c0_i32, %c0_i32_0 : i32, i32
  }
  func.func @transform_5(%arg0: i32) -> (i32, i32) {
    %c0_i32 = arith.constant 0 : i32
    %c0_i32_0 = arith.constant 0 : i32
    %c0_i32_1 = arith.constant 0 : i32
    return %c0_i32, %c0_i32_0 : i32, i32
  }
  func.func @transform_6(%arg0: i32) -> (i32, i32) {
    %c0_i32 = arith.constant 0 : i32
    %c0_i32_0 = arith.constant 0 : i32
    %c0_i32_1 = arith.constant 0 : i32
    return %c0_i32, %c0_i32_0 : i32, i32
  }
  func.func @transform_7(%arg0: i32) -> (i32, i32) {
    %c0_i32 = arith.constant 0 : i32
    %c0_i32_0 = arith.constant 0 : i32
    %c0_i32_1 = arith.constant 0 : i32
    return %c0_i32, %c0_i32_0 : i32, i32
  }
  func.func @transform_8(%arg0: i32) -> (i32, i32) {
    %c0_i32 = arith.constant 0 : i32
    %c0_i32_0 = arith.constant 0 : i32
    %c0_i32_1 = arith.constant 0 : i32
    return %c0_i32, %c0_i32_0 : i32, i32
  }
  func.func @transform_9(%arg0: i32) -> (i32, i32) {
    %c0_i32 = arith.constant 0 : i32
    %c0_i32_0 = arith.constant 0 : i32
    %c0_i32_1 = arith.constant 0 : i32
    return %c0_i32, %c0_i32_0 : i32, i32
  }
  func.func @transform_10(%arg0: i32) -> (i32, i32) {
    %c0_i32 = arith.constant 0 : i32
    %c0_i32_0 = arith.constant 0 : i32
    %c0_i32_1 = arith.constant 0 : i32
    return %c0_i32, %c0_i32_0 : i32, i32
  }
  func.func @transform_11(%arg0: i32) -> (i32, i32) {
    %c0_i32 = arith.constant 0 : i32
    %c0_i32_0 = arith.constant 0 : i32
    %c0_i32_1 = arith.constant 0 : i32
    return %c0_i32, %c0_i32_0 : i32, i32
  }
  func.func @transform_12(%arg0: i32) -> (i32, i32) {
    %c0_i32 = arith.constant 0 : i32
    %c0_i32_0 = arith.constant 0 : i32
    %c0_i32_1 = arith.constant 0 : i32
    return %c0_i32, %c0_i32_0 : i32, i32
  }
  func.func @transform_13(%arg0: i32) -> (i32, i32) {
    %c0_i32 = arith.constant 0 : i32
    %c0_i32_0 = arith.constant 0 : i32
    %c0_i32_1 = arith.constant 0 : i32
    return %c0_i32, %c0_i32_0 : i32, i32
  }
  func.func @transform_14(%arg0: i32) -> (i32, i32) {
    %c0_i32 = arith.constant 0 : i32
    %c0_i32_0 = arith.constant 0 : i32
    %c0_i32_1 = arith.constant 0 : i32
    return %c0_i32, %c0_i32_0 : i32, i32
  }
  func.func @transform_15(%arg0: i32) -> (i32, i32) {
    %c0_i32 = arith.constant 0 : i32
    %c0_i32_0 = arith.constant 0 : i32
    %c0_i32_1 = arith.constant 0 : i32
    return %c0_i32, %c0_i32_0 : i32, i32
  }
  func.func @transform_16(%arg0: i32) -> (i32, i32) {
    %c0_i32 = arith.constant 0 : i32
    %c0_i32_0 = arith.constant 0 : i32
    %c0_i32_1 = arith.constant 0 : i32
    return %c0_i32, %c0_i32_0 : i32, i32
  }
  func.func @transform_17(%arg0: i32) -> (i32, i32) {
    %c0_i32 = arith.constant 0 : i32
    %c0_i32_0 = arith.constant 0 : i32
    %c0_i32_1 = arith.constant 0 : i32
    return %c0_i32, %c0_i32_0 : i32, i32
  }
}

</mosaic_0001>

<bundles_post_ra>
// kernel: forward.1
= control target key start
LH: loop header
LB: loop body
LE: loop exit
PB: predicated region body
PF: predicated region fallthrough
CT: control target
= control target key end

     0   :  { %s3894_s0 = inlined_call_operand.vmem [shape: f32[2,32], index: 0, kind: input, shape index: {}]   ;;  %s3895_s1 = inlined_call_operand.vmem [shape: f32[2,32], index: 1, kind: input, shape index: {}]   ;;  %s3896_s2 = inlined_call_operand.vmem [shape: f32[2,32], index: 2, kind: input, shape index: {}]   ;;  %s3897_s3 = inlined_call_operand.vmem [shape: f32[2,24], index: 3, kind: input, shape index: {}]   ;;  %s3898_s4 = inlined_call_operand.vmem [shape: f32[2,24], index: 4, kind: input, shape index: {}]   ;;  %s3899_s5 = inlined_call_operand.vmem [shape: f32[2,16], index: 5, kind: input, shape index: {}]   ;;  %s3900_s6 = inlined_call_operand.vmem [shape: f32[2,16], index: 6, kind: input, shape index: {}]   ;;  %s3901_s7 = inlined_call_operand.vmem [shape: f32[32,1024], index: 7, kind: input, shape index: {}]   ;;  %s3902_s8 = inlined_call_operand.vmem [shape: f32[24,384], index: 8, kind: input, shape index: {}]   ;;  %s3903_s9 = inlined_call_operand.vmem [shape: f32[16,256], index: 9, kind: input, shape index: {}]   ;;  %s3904_s10 = inlined_call_operand.vmem [shape: f32[16,256], index: 10, kind: input, shape index: {}]   ;;  %s3905_s11 = inlined_call_operand.vmem [shape: f32[16,256], index: 11, kind: input, shape index: {}]   ;;  %s3906_s12 = inlined_call_operand.vmem [shape: f32[16,256], index: 12, kind: input, shape index: {}]   ;;  %s3907_s13 = inlined_call_operand.vmem [shape: f32[1664,64], index: 13, kind: input, shape index: {}]   ;;  %s3908_s14 = inlined_call_operand.vmem [shape: f32[256,16], index: 14, kind: input, shape index: {}]   ;;  %s3909_s15 = inlined_call_operand.vmem [shape: f32[1,64], index: 15, kind: input, shape index: {}]   ;;  %s3910_s16 = inlined_call_operand.vmem [shape: f32[3,16], index: 16, kind: input, shape index: {}]   ;;  %s3911_s17 = inlined_call_operand.hbm [shape: f32[2,16], index: 17, kind: output, shape index: {}]  }
   0x1   :  { %3912 = sst [smem:[#allocation5_spill]] %s3894_s0 }
   0x2   :  { %3913 = sst [smem:[#allocation6_spill]] %s3895_s1 }
   0x3   :  { %v83_v0 = vld [vmem:[%s3901_s7 + $0xc8] sm:$0xff]  ;;  %v85_v1 = vld [vmem:[%s3901_s7 + $0xd8] sm:$0xff]  ;;  %v82_v2 = vld [vmem:[%s3901_s7 + $0xc0] sm:$0xff]  ;;  %s3914_s28 = sld [smem:[#allocation5_spill]]  ;;  %vm90_vm0 = vcmask 261120   ;;  %v2452_v17 = vmov 0.0  }
   0x4   :  { %118 = vmatprep.subr.mxu0 %v83_v0  ;;  %189 = vmatprep.subr.mxu1 %v85_v1  ;;  %v84_v3 = vld [vmem:[%s3901_s7 + $0xd0] sm:$0xff]  ;;  %v75_v4 = vld [vmem:[%s3901_s7 + $0x88] sm:$0xff]  ;;  %v77_v5 = vld [vmem:[%s3901_s7 + $0x98] sm:$0xff]  ;;  %vm388_vm1 = vcmask 195584   ;;  %s3915_s23 = sld [smem:[#allocation6_spill]]  ;;  %vm2453_vm2 = vmmov 0  }
   0x5   :  { %119 = vmatpush1.msra.mxu0 %v82_v2  ;;  %190 = vmatpush1.msra.mxu1 %v84_v3  ;;  %v74_v6 = vld [vmem:[%s3901_s7 + $0x80] sm:$0xff]  ;;  %v76_v7 = vld [vmem:[%s3901_s7 + $0x90] sm:$0xff]  ;;  %v67_v8 = vld [vmem:[%s3901_s7 + $0x48] sm:$0xff]  ;;  %vm538_vm3 = vcmask 130048   ;;  %s2455_s19 = smov 96  }
   0x6   :  { %120 = vmatprep.subr.mxu0 %v75_v4  ;;  %191 = vmatprep.subr.mxu1 %v77_v5  ;;  %v69_v9 = vld [vmem:[%s3901_s7 + $0x58] sm:$0xff]  ;;  %v66_v10 = vld [vmem:[%s3901_s7 + $0x40] sm:$0xff]  ;;  %v68_v11 = vld [vmem:[%s3901_s7 + $0x50] sm:$0xff] }
   0x7   :  { %121 = vmatpush1.msra.mxu0 %v74_v6  ;;  %192 = vmatpush1.msra.mxu1 %v76_v7  ;;  %v59_v12 = vld [vmem:[%s3901_s7 + $0x8] sm:$0xff]  ;;  %v61_v13 = vld [vmem:[%s3901_s7 + $0x18] sm:$0xff]  ;;  %v58_v14 = vld [vmem:[%s3901_s7] sm:$0xff] }
   0x8   :  { %122 = vmatprep.subr.mxu0 %v67_v8  ;;  %193 = vmatprep.subr.mxu1 %v69_v9  ;;  %v60_v15 = vld [vmem:[%s3901_s7 + $0x10] sm:$0xff]  ;;  %v87_v18 = vld [vmem:[%s3901_s7 + $0xe8] sm:$0xff]  ;;  %v89_v19 = vld [vmem:[%s3901_s7 + $0xf8] sm:$0xff] }
   0x9   :  { %123 = vmatpush1.msra.mxu0 %v66_v10  ;;  %194 = vmatpush1.msra.mxu1 %v68_v11  ;;  %v57_v16 = vld [vmem:[%s3914_s28] sm:$0x3]  ;;  %v88_v21 = vld [vmem:[%s3901_s7 + $0xf0] sm:$0xff]  ;;  %v79_v22 = vld [vmem:[%s3901_s7 + $0xa8] sm:$0xff]  ;;  %s2454_s28 = smov 32  }
   0xa   :  { %124 = vmatprep.subr.mxu0 %v59_v12  ;;  %195 = vmatprep.subr.mxu1 %v61_v13  ;;  %v86_v20 = vld [vmem:[%s3901_s7 + $0xe0] sm:$0xff]  ;;  %v81_v23 = vld [vmem:[%s3901_s7 + $0xb8] sm:$0xff]  ;;  %v80_v25 = vld [vmem:[%s3901_s7 + $0xb0] sm:$0xff] }
   0xb   :  { %125 = vmatpush1.msra.mxu0 %v58_v14  ;;  %158 = vmatprep.mubr.f32.mxu0 %v2452_v17  ;;  %v78_v24 = vld [vmem:[%s3901_s7 + $0xa0] sm:$0xff]  ;;  %v71_v26 = vld [vmem:[%s3901_s7 + $0x68] sm:$0xff]  ;;  %v73_v27 = vld [vmem:[%s3901_s7 + $0x78] sm:$0xff] }
   0xc   :  { %196 = vmatpush1.msra.mxu1 %v60_v15  ;;  %229 = vmatprep.mubr.f32.mxu1 %v2452_v17  ;;  %v70_v28 = vld [vmem:[%s3901_s7 + $0x60] sm:$0xff]  ;;  %v72_v29 = vld [vmem:[%s3901_s7 + $0x70] sm:$0xff]  ;;  %v63_v30 = vld [vmem:[%s3901_s7 + $0x28] sm:$0xff] }
   0xd   :  { %2018 = vmatmul.mubr.msk.f32.vlgmr.msra.gmra.mxu0 %vm90_vm0, %v57_v16  ;;  %2019 = vmatmul.mubr.msk.f32.vlgmr.msra.gmra.mxu1 %vm90_vm0, %v57_v16  ;;  %v65_v31 = vld [vmem:[%s3901_s7 + $0x38] sm:$0xff]  ;;  %v62_v32 = vld [vmem:[%s3901_s7 + $0x20] sm:$0xff]  ;;  %v64_v33 = vld [vmem:[%s3901_s7 + $0x30] sm:$0xff] }
   0xe   :  { %260 = vmatprep.subr.mxu0 %v87_v18  ;;  %331 = vmatprep.subr.mxu1 %v89_v19  ;;  %v386_v34 = vld [vmem:[%s3902_s8 + $0x38] sm:$0xff]  ;;  %v385_v35 = vld [vmem:[%s3902_s8 + $0x30] sm:$0xff]  ;;  %v383_v36 = vld [vmem:[%s3902_s8 + $0x20] sm:$0xff] }
   0xf   :  { %261 = vmatpush1.msra.mxu0 %v86_v20  ;;  %332 = vmatpush1.msra.mxu1 %v88_v21  ;;  %v387_v37 = vld [vmem:[%s3902_s8 + $0x40] sm:$0xff]  ;;  %v382_v38 = vld [vmem:[%s3902_s8 + $0x18] sm:$0xff]  ;;  %v380_v39 = vld [vmem:[%s3902_s8 + $0x8] sm:$0xff] }
  0x10   :  { %262 = vmatprep.subr.mxu0 %v79_v22  ;;  %333 = vmatprep.subr.mxu1 %v81_v23  ;;  %v384_v40 = vld [vmem:[%s3902_s8 + $0x28] sm:$0xff]  ;;  %v379_v41 = vld [vmem:[%s3902_s8] sm:$0xff]  ;;  %v381_v43 = vld [vmem:[%s3902_s8 + $0x10] sm:$0xff] }
  0x11   :  { %263 = vmatpush1.msra.mxu0 %v78_v24  ;;  %334 = vmatpush1.msra.mxu1 %v80_v25  ;;  %v378_v42 = vld [vmem:[%s3897_s3] sm:$0x3]  ;;  %v537_v44 = vld [vmem:[%s3903_s9 + $0x18] sm:$0xff]  ;;  %v536_v46 = vld [vmem:[%s3903_s9 + $0x10] sm:$0xff]  ;;  %s2456_s3 = smov 64  }
  0x12   :  { %264 = vmatprep.subr.mxu0 %v71_v26  ;;  %335 = vmatprep.subr.mxu1 %v73_v27  ;;  %v2707_v45 = vld [vmem:[%s3915_s23] sm:$0x3]  ;;  %v535_v47 = vld [vmem:[%s3903_s9 + $0x8] sm:$0xff]  ;;  %v821_v49 = vld [vmem:[%s3907_s13 + $0x1f8] sm:$0xff] }
  0x13   :  { %265 = vmatpush1.msra.mxu0 %v70_v28  ;;  %336 = vmatpush1.msra.mxu1 %v72_v29  ;;  %v534_v48 = vld [vmem:[%s3903_s9] sm:$0xff]  ;;  %v789_v51 = vld [vmem:[%s3907_s13 + $0xf8] sm:$0xff]  ;;  %v788_v55 = vld [vmem:[%s3907_s13 + $0xf0] sm:$0xff] }
  0x14   :  { %266 = vmatprep.subr.mxu0 %v63_v30  ;;  %337 = vmatprep.subr.mxu1 %v65_v31  ;;  %v533_v50 = vld [vmem:[%s3899_s5] sm:$0x3]  ;;  %v805_v52 = vld [vmem:[%s3907_s13 + $0x178] sm:$0xff]  ;;  %v820_v56 = vld [vmem:[%s3907_s13 + $0x1f0] sm:$0xff] }
  0x15   :  { %267 = vmatpush1.msra.mxu0 %v62_v32  ;;  %300 = vmatprep.mubr.f32.mxu0 %v2452_v17  ;;  %v2742_v53 = vld [vmem:[%s3896_s2] sm:$0x3]  ;;  %v773_v54 = vld [vmem:[%s3907_s13 + $0x78] sm:$0xff]  ;;  %v772_v57 = vld [vmem:[%s3907_s13 + $0x70] sm:$0xff] }
  0x16   :  { %338 = vmatpush1.msra.mxu1 %v64_v33  ;;  %371 = vmatprep.mubr.f32.mxu1 %v2452_v17  ;;  %v804_v58 = vld [vmem:[%s3907_s13 + $0x170] sm:$0xff]  ;;  %v787_v59 = vld [vmem:[%s3907_s13 + $0xe8] sm:$0xff] }
  0x17   :  { %2020 = vmatmul.mubr.msk.f32.vlgmr.msra.gmra.mxu0 %vm90_vm0, %v57_v16  ;;  %2021 = vmatmul.mubr.msk.f32.vlgmr.msra.gmra.mxu1 %vm90_vm0, %v57_v16 }
  0x18   :  { %418 = vmatprep.subr.mxu0 %v386_v34  ;;  %456 = vmatprep.mubr.f32.mxu0 %v2452_v17 }
  0x19   :  { %419 = vmatpush1.msra.mxu0 %v385_v35  ;;  %2368 = vmatprep.subr.mxu1 %v2452_v17 }
  0x1a   :  { %420 = vmatprep.subr.mxu0 %v383_v36  ;;  %2369 = vmatpush3.msra.mxu1 %v387_v37 }
  0x1b   :  { %421 = vmatpush1.msra.mxu0 %v382_v38  ;;  %2370 = vmatprep.subr.mxu1 %v2452_v17 }
  0x1c   :  { %422 = vmatprep.subr.mxu0 %v380_v39  ;;  %2371 = vmatpush3.msra.mxu1 %v384_v40 }
  0x1d   :  { %423 = vmatpush1.msra.mxu0 %v379_v41  ;;  %2372 = vmatprep.subr.mxu1 %v2452_v17 }
  0x1e   :  { %2022 = vmatmul.mubr.msk.f32.vlgmr.msra.gmra.mxu0 %vm388_vm1, %v378_v42  ;;  %2373 = vmatpush3.msra.mxu1 %v381_v43 }
  0x1f   :  { %2374 = vmatprep.mubr.msk.f32.mxu1 %vm2453_vm2, %v2452_v17  ;;  %570 = vmatprep.subr.mxu1 %v537_v44 }
  0x20   :  { %2375 = vmatmul.mubr.msk.f32.vlgmr.msra.gmra.mxu1 %vm388_vm1, %v378_v42  ;;  %615 = vrot.lane.b32.xlu0 %v2707_v45, %s2454_s28 }
  0x21   :  { %571 = vmatpush1.msra.mxu1 %v536_v46  ;;  %606 = vmatprep.mubr.f32.mxu1 %v2452_v17 }
  0x22   :  { %572 = vmatprep.subr.mxu1 %v535_v47  ;;  %621 = vrot.lane.b32.xlu1 %v2707_v45, %s2455_s19 }
  0x23   :  { %573 = vmatpush1.msra.mxu1 %v534_v48  ;;  %2071 = vmatprep.subr.mxu0 %v821_v49 }
  0x24   :  { %2024 = vmatmul.mubr.msk.f32.vlgmr.msra.gmra.mxu1 %vm538_vm3, %v533_v50  ;;  %618 = vrot.lane.b32.xlu0 %v2707_v45, %s2456_s3 }
  0x25   :  { %2036 = vmatprep.subr.mxu1 %v789_v51  ;;  %2072 = vmatpush3.msra.mxu0 %v805_v52 }
  0x26   :  { %631 = vrot.lane.b32.xlu1 %v2742_v53, %s2454_s28  ;;  %2037 = vmatpush3.msra.mxu1 %v773_v54 }
  0x27   :  { %22 = vsyncpa [#allocation3], 0  ;;  %2038 = vmatprep.subr.mxu1 %v788_v55  ;;  %2073 = vmatprep.subr.mxu0 %v820_v56  ;;  %v819_v60 = vld [vmem:[%s3907_s13 + $0x1e8] sm:$0xff]  ;;  %v2781_v63 = vld [vmem:[%s3898_s4] sm:$0x3]  ;;  %s2457_s0 = smov 120  }
  0x28   :  { %634 = vrot.lane.b32.xlu0 %v2742_v53, %s2456_s3  ;;  %2039 = vmatpush3.msra.mxu1 %v772_v57  ;;  %v771_v61 = vld [vmem:[%s3907_s13 + $0x68] sm:$0xff]  ;;  %v786_v0 = vld [vmem:[%s3907_s13 + $0xe0] sm:$0xff]  ;;  %v785_v4 = vld [vmem:[%s3907_s13 + $0xd8] sm:$0xff]  ;;  %s2458_s21 = smov 16   ;;  %s2459_s26 = smov 24   ;;  %vm625_vm4 = vcmask 523264  }
  0x29   :  { %v803_v62 = vld [vmem:[%s3907_s13 + $0x168] sm:$0xff]  ;;  %2074 = vmatpush3.msra.mxu0 %v804_v58  ;;  %2040 = vmatprep.subr.mxu1 %v787_v59  ;;  %v818_v1 = vld [vmem:[%s3907_s13 + $0x1e0] sm:$0xff]  ;;  %v817_v5 = vld [vmem:[%s3907_s13 + $0x1d8] sm:$0xff]  ;;  %s2460_s18 = smov 40   ;;  %s2461_s23 = smov 48   ;;  %vm627_vm5 = vcmask 785408  }
  0x2a   :  { %637 = vrot.lane.b32.xlu1 %v2742_v53, %s2455_s19  ;;  %2075 = vmatprep.subr.mxu0 %v819_v60  ;;  %v770_v2 = vld [vmem:[%s3907_s13 + $0x60] sm:$0xff]  ;;  %v769_v6 = vld [vmem:[%s3907_s13 + $0x58] sm:$0xff]  ;;  %v784_v8 = vld [vmem:[%s3907_s13 + $0xd0] sm:$0xff]  ;;  %s2462_s1 = smov 72   ;;  %s2463_s25 = smov 88   ;;  %vm707_vm6 = vcmask 326656  }
  0x2b   :  { %2041 = vmatpush3.msra.mxu1 %v771_v61  ;;  %2076 = vmatpush3.msra.mxu0 %v803_v62  ;;  %v802_v3 = vld [vmem:[%s3907_s13 + $0x160] sm:$0xff]  ;;  %v801_v7 = vld [vmem:[%s3907_s13 + $0x158] sm:$0xff]  ;;  %v816_v9 = vld [vmem:[%s3907_s13 + $0x1d0] sm:$0xff]  ;;  %s2464_s24 = smov 112   ;;  %s2465_s27 = smov 8   ;;  %vm710_vm7 = vcmask 719872  }
  0x2c   :  { %665 = vrot.lane.b32.xlu0 %v2781_v63, %s2457_s0  ;;  %2042 = vmatprep.subr.mxu1 %v786_v0  ;;  %v768_v10 = vld [vmem:[%s3907_s13 + $0x50] sm:$0xff]  ;;  %v783_v12 = vld [vmem:[%s3907_s13 + $0xc8] sm:$0xff]  ;;  %v782_v16 = vld [vmem:[%s3907_s13 + $0xc0] sm:$0xff]  ;;  %s2466_s4 = smov 80   ;;  %s2467_s22 = smov 56   ;;  %vm712_vm8 = vcmask 916480  }
  0x2d   :  { %2077 = vmatprep.subr.mxu0 %v818_v1  ;;  %2043 = vmatpush3.msra.mxu1 %v770_v2  ;;  %v800_v11 = vld [vmem:[%s3907_s13 + $0x150] sm:$0xff]  ;;  %v815_v13 = vld [vmem:[%s3907_s13 + $0x1c8] sm:$0xff]  ;;  %v814_v18 = vld [vmem:[%s3907_s13 + $0x1c0] sm:$0xff]  ;;  %s2468_s5 = smov 104   ;;  %vm714_vm9 = vcmask 64512   ;;  %vm699_vm10 = vcmask 392192  }
  0x2e   :  { %668 = vrot.lane.b32.xlu1 %v2781_v63, %s2458_s21  ;;  %2078 = vmatpush3.msra.mxu0 %v802_v3  ;;  %v767_v14 = vld [vmem:[%s3907_s13 + $0x48] sm:$0xff]  ;;  %v766_v19 = vld [vmem:[%s3907_s13 + $0x40] sm:$0xff]  ;;  %v781_v21 = vld [vmem:[%s3907_s13 + $0xb8] sm:$0xff]  ;;  %vm719_vm11 = vcmask 654336   ;;  %vm701_vm12 = vcmask 588800   ;;  %vm717_vm13 = vcmask 457728  }
  0x2f   :  { %2044 = vmatprep.subr.mxu1 %v785_v4  ;;  %2079 = vmatprep.subr.mxu0 %v817_v5  ;;  %v799_v15 = vld [vmem:[%s3907_s13 + $0x148] sm:$0xff]  ;;  %v798_v20 = vld [vmem:[%s3907_s13 + $0x140] sm:$0xff]  ;;  %v813_v22 = vld [vmem:[%s3907_s13 + $0x1b8] sm:$0xff]  ;;  %vm704_vm14 = vcmask 982016   ;;  %vm721_vm15 = vcmask 850944  }
  0x30   :  { %653 = vrot.lane.b32.xlu0 %v2781_v63, %s2459_s26  ;;  %2045 = vmatpush3.msra.mxu1 %v769_v6  ;;  %v765_v23 = vld [vmem:[%s3907_s13 + $0x38] sm:$0xff]  ;;  %v780_v25 = vld [vmem:[%s3907_s13 + $0xb0] sm:$0xff]  ;;  %v779_v29 = vld [vmem:[%s3907_s13 + $0xa8] sm:$0xff] }
  0x31   :  { %2080 = vmatpush3.msra.mxu0 %v801_v7  ;;  %2046 = vmatprep.subr.mxu1 %v784_v8  ;;  %v797_v24 = vld [vmem:[%s3907_s13 + $0x138] sm:$0xff]  ;;  %v812_v26 = vld [vmem:[%s3907_s13 + $0x1b0] sm:$0xff]  ;;  %v811_v30 = vld [vmem:[%s3907_s13 + $0x1a8] sm:$0xff] }
  0x32   :  { %671 = vrot.lane.b32.xlu1 %v2781_v63, %s2460_s18  ;;  %2081 = vmatprep.subr.mxu0 %v816_v9  ;;  %v764_v27 = vld [vmem:[%s3907_s13 + $0x30] sm:$0xff]  ;;  %v2891_v31 = vld [vmem:[%s3900_s6] sm:$0x3]  ;;  %v763_v32 = vld [vmem:[%s3907_s13 + $0x28] sm:$0xff] }
  0x33   :  { %2047 = vmatpush3.msra.mxu1 %v768_v10  ;;  %2082 = vmatpush3.msra.mxu0 %v800_v11  ;;  %v796_v28 = vld [vmem:[%s3907_s13 + $0x130] sm:$0xff]  ;;  %v795_v33 = vld [vmem:[%s3907_s13 + $0x128] sm:$0xff]  ;;  %v778_v34 = vld [vmem:[%s3907_s13 + $0xa0] sm:$0xff] }
  0x34   :  { %656 = vrot.lane.b32.xlu0 %v2781_v63, %s2461_s23  ;;  %2048 = vmatprep.subr.mxu1 %v783_v12  ;;  %v810_v35 = vld [vmem:[%s3907_s13 + $0x1a0] sm:$0xff]  ;;  %v777_v38 = vld [vmem:[%s3907_s13 + $0x98] sm:$0xff]  ;;  %v776_v42 = vld [vmem:[%s3907_s13 + $0x90] sm:$0xff] }
  0x35   :  { %2083 = vmatprep.subr.mxu0 %v815_v13  ;;  %2049 = vmatpush3.msra.mxu1 %v767_v14  ;;  %v762_v36 = vld [vmem:[%s3907_s13 + $0x20] sm:$0xff]  ;;  %v809_v39 = vld [vmem:[%s3907_s13 + $0x198] sm:$0xff]  ;;  %v808_v43 = vld [vmem:[%s3907_s13 + $0x190] sm:$0xff] }
  0x36   :  { %674 = vrot.lane.b32.xlu1 %v2781_v63, %s2456_s3  ;;  %2084 = vmatpush3.msra.mxu0 %v799_v15  ;;  %v794_v37 = vld [vmem:[%s3907_s13 + $0x120] sm:$0xff]  ;;  %v761_v40 = vld [vmem:[%s3907_s13 + $0x18] sm:$0xff]  ;;  %v760_v44 = vld [vmem:[%s3907_s13 + $0x10] sm:$0xff] }
  0x37   :  { %2050 = vmatprep.subr.mxu1 %v782_v16  ;;  %2085 = vmatprep.subr.mxu0 %v814_v18  ;;  %v793_v41 = vld [vmem:[%s3907_s13 + $0x118] sm:$0xff]  ;;  %v792_v46 = vld [vmem:[%s3907_s13 + $0x110] sm:$0xff]  ;;  %v775_v47 = vld [vmem:[%s3907_s13 + $0x88] sm:$0xff] }
  0x38   :  { %659 = vrot.lane.b32.xlu0 %v2781_v63, %s2462_s1  ;;  %2051 = vmatpush3.msra.mxu1 %v766_v19  ;;  %v807_v48 = vld [vmem:[%s3907_s13 + $0x188] sm:$0xff]  ;;  %v774_v51 = vld [vmem:[%s3907_s13 + $0x80] sm:$0xff]  ;;  %v853_v56 = vld [vmem:[%s3907_s13 + $0x2f8] sm:$0xff] }
  0x39   :  { %2086 = vmatpush3.msra.mxu0 %v798_v20  ;;  %2052 = vmatprep.subr.mxu1 %v781_v21  ;;  %v759_v49 = vld [vmem:[%s3907_s13 + $0x8] sm:$0xff]  ;;  %v806_v52 = vld [vmem:[%s3907_s13 + $0x180] sm:$0xff]  ;;  %v885_v57 = vld [vmem:[%s3907_s13 + $0x3f8] sm:$0xff] }
  0x3a   :  { %677 = vrot.lane.b32.xlu1 %v2781_v63, %s2463_s25  ;;  %2087 = vmatprep.subr.mxu0 %v813_v22  ;;  %v791_v50 = vld [vmem:[%s3907_s13 + $0x108] sm:$0xff]  ;;  %v758_v54 = vld [vmem:[%s3907_s13] sm:$0xff]  ;;  %v837_v12 = vld [vmem:[%s3907_s13 + $0x278] sm:$0xff] }
  0x3b   :  { %2053 = vmatpush3.msra.mxu1 %v765_v23  ;;  %2088 = vmatpush3.msra.mxu0 %v797_v24  ;;  %v790_v55 = vld [vmem:[%s3907_s13 + $0x100] sm:$0xff]  ;;  %v869_v13 = vld [vmem:[%s3907_s13 + $0x378] sm:$0xff]  ;;  %v852_v15 = vld [vmem:[%s3907_s13 + $0x2f0] sm:$0xff] }
  0x3c   :  { %662 = vrot.lane.b32.xlu0 %v2781_v63, %s2455_s19  ;;  %2054 = vmatprep.subr.mxu1 %v780_v25  ;;  %v884_v16 = vld [vmem:[%s3907_s13 + $0x3f0] sm:$0xff]  ;;  %v851_v20 = vld [vmem:[%s3907_s13 + $0x2e8] sm:$0xff]  ;;  %v850_v24 = vld [vmem:[%s3907_s13 + $0x2e0] sm:$0xff] }
  0x3d   :  { %2089 = vmatprep.subr.mxu0 %v812_v26  ;;  %2055 = vmatpush3.msra.mxu1 %v764_v27  ;;  %v836_v18 = vld [vmem:[%s3907_s13 + $0x270] sm:$0xff]  ;;  %v883_v21 = vld [vmem:[%s3907_s13 + $0x3e8] sm:$0xff]  ;;  %v882_v25 = vld [vmem:[%s3907_s13 + $0x3e0] sm:$0xff] }
  0x3e   :  { %680 = vrot.lane.b32.xlu1 %v2781_v63, %s2464_s24  ;;  %2090 = vmatpush3.msra.mxu0 %v796_v28  ;;  %v868_v19 = vld [vmem:[%s3907_s13 + $0x370] sm:$0xff]  ;;  %v835_v22 = vld [vmem:[%s3907_s13 + $0x268] sm:$0xff]  ;;  %v834_v27 = vld [vmem:[%s3907_s13 + $0x260] sm:$0xff] }
  0x3f   :  { %2056 = vmatprep.subr.mxu1 %v779_v29  ;;  %2091 = vmatprep.subr.mxu0 %v811_v30  ;;  %v867_v23 = vld [vmem:[%s3907_s13 + $0x368] sm:$0xff]  ;;  %v866_v28 = vld [vmem:[%s3907_s13 + $0x360] sm:$0xff]  ;;  %v849_v30 = vld [vmem:[%s3907_s13 + $0x2d8] sm:$0xff] }
  0x40   :  { %728 = vrot.lane.b32.xlu0 %v2891_v31, %s2458_s21  ;;  %2057 = vmatpush3.msra.mxu1 %v763_v32  ;;  %v881_v32 = vld [vmem:[%s3907_s13 + $0x3d8] sm:$0xff] }
  0x41   :  { %2092 = vmatpush3.msra.mxu0 %v795_v33  ;;  %2058 = vmatprep.subr.mxu1 %v778_v34  ;;  %v833_v33 = vld [vmem:[%s3907_s13 + $0x258] sm:$0xff] }
  0x42   :  { %731 = vrot.lane.b32.xlu1 %v2891_v31, %s2454_s28  ;;  %2093 = vmatprep.subr.mxu0 %v810_v35  ;;  %v865_v34 = vld [vmem:[%s3907_s13 + $0x358] sm:$0xff]  ;;  %v848_v35 = vld [vmem:[%s3907_s13 + $0x2d0] sm:$0xff] }
  0x43   :  { %2059 = vmatpush3.msra.mxu1 %v762_v36  ;;  %2094 = vmatpush3.msra.mxu0 %v794_v37  ;;  %v880_v36 = vld [vmem:[%s3907_s13 + $0x3d0] sm:$0xff] }
  0x44   :  { %734 = vrot.lane.b32.xlu0 %v2891_v31, %s2461_s23  ;;  %2060 = vmatprep.subr.mxu1 %v777_v38  ;;  %v832_v38 = vld [vmem:[%s3907_s13 + $0x250] sm:$0xff] }
  0x45   :  { %2095 = vmatprep.subr.mxu0 %v809_v39  ;;  %2061 = vmatpush3.msra.mxu1 %v761_v40  ;;  %v864_v39 = vld [vmem:[%s3907_s13 + $0x350] sm:$0xff]  ;;  %v847_v40 = vld [vmem:[%s3907_s13 + $0x2c8] sm:$0xff] }
  0x46   :  { %683 = vrot.lane.b32.xlu1 %v2781_v63, %s2465_s27  ;;  %2096 = vmatpush3.msra.mxu0 %v793_v41  ;;  %v879_v41 = vld [vmem:[%s3907_s13 + $0x3c8] sm:$0xff] }
  0x47   :  { %2062 = vmatprep.subr.mxu1 %v776_v42  ;;  %2097 = vmatprep.subr.mxu0 %v808_v43  ;;  %v831_v43 = vld [vmem:[%s3907_s13 + $0x248] sm:$0xff] }
  0x48   :  { %737 = vrot.lane.b32.xlu0 %v2891_v31, %s2456_s3  ;;  %2063 = vmatpush3.msra.mxu1 %v760_v44  ;;  %v863_v44 = vld [vmem:[%s3907_s13 + $0x348] sm:$0xff] }
  0x49   :  { %2098 = vmatpush3.msra.mxu0 %v792_v46  ;;  %2064 = vmatprep.subr.mxu1 %v775_v47  ;;  %v846_v47 = vld [vmem:[%s3907_s13 + $0x2c0] sm:$0xff] }
  0x4a   :  { %686 = vrot.lane.b32.xlu1 %v2781_v63, %s2454_s28  ;;  %2099 = vmatprep.subr.mxu0 %v807_v48  ;;  %v878_v48 = vld [vmem:[%s3907_s13 + $0x3c0] sm:$0xff] }
  0x4b   :  { %2065 = vmatpush3.msra.mxu1 %v759_v49  ;;  %2100 = vmatpush3.msra.mxu0 %v791_v50  ;;  %v830_v50 = vld [vmem:[%s3907_s13 + $0x240] sm:$0xff] }
  0x4c   :  { %740 = vrot.lane.b32.xlu0 %v2891_v31, %s2466_s4  ;;  %2066 = vmatprep.subr.mxu1 %v774_v51  ;;  %v862_v51 = vld [vmem:[%s3907_s13 + $0x340] sm:$0xff] }
  0x4d   :  { %2101 = vmatprep.subr.mxu0 %v806_v52  ;;  %2067 = vmatpush3.msra.mxu1 %v758_v54  ;;  %v845_v52 = vld [vmem:[%s3907_s13 + $0x2b8] sm:$0xff] }
  0x4e   :  { %689 = vrot.lane.b32.xlu1 %v2781_v63, %s2467_s22  ;;  %2102 = vmatpush3.msra.mxu0 %v790_v55  ;;  %v877_v54 = vld [vmem:[%s3907_s13 + $0x3b8] sm:$0xff] }
  0x4f   :  { %2106 = vmatprep.subr.mxu1 %v853_v56  ;;  %2141 = vmatprep.subr.mxu0 %v885_v57  ;;  %v829_v56 = vld [vmem:[%s3907_s13 + $0x238] sm:$0xff] }
  0x50   :  { %743 = vrot.lane.b32.xlu0 %v2891_v31, %s2455_s19  ;;  %v861_v57 = vld [vmem:[%s3907_s13 + $0x338] sm:$0xff] }
  0x52   :  { %692 = vrot.lane.b32.xlu1 %v2781_v63, %s2466_s4 }
  0x54   :  { %746 = vrot.lane.b32.xlu0 %v2891_v31, %s2464_s24 }
  0x56   :  { %695 = vrot.lane.b32.xlu1 %v2781_v63, %s2468_s5 }
  0x92   :  { %v616_v58 = vpop.permute.xlu0 %615 }
  0x93   :  { %v624_v62 = vsel %vm90_vm0, %v2707_v45, %v616_v58  ;;  %v844_v58 = vld [vmem:[%s3907_s13 + $0x2b0] sm:$0xff] }
  0x94   :  { %v622_v59 = vpop.permute.xlu1 %621 }
  0x96   :  { %v619_v61 = vpop.permute.xlu0 %618 }
  0x97   :  { %v626_v1 = vsel %vm625_vm4, %v624_v62, %v619_v61 }
  0x98   :  { %v2988_v60 = vpop.permute.xlu1 %631  ;;  %v628_v5 = vsel %vm627_vm5, %v626_v1, %v622_v59  ;;  %v876_v59 = vld [vmem:[%s3907_s13 + $0x3b0] sm:$0xff] }
  0x99   :  { %v828_v1 = vld [vmem:[%s3907_s13 + $0x230] sm:$0xff] }
  0x9a   :  { %v2992_v0 = vpop.permute.xlu0 %634 }
  0x9c   :  { %v2995_v2 = vpop.permute.xlu1 %637 }
  0x9e   :  { %v2998_v10 = vpop.permute.xlu0 %665 }
  0xa0   :  { %v3006_v14 = vpop.permute.xlu1 %668 }
  0xa2   :  { %v3038_v26 = vpop.permute.xlu0 %653 }
  0xa4   :  { %v3046_v29 = vpop.permute.xlu1 %671 }
  0xa6   :  { %v3080_v42 = vpop.permute.xlu0 %656 }
  0xa8   :  { %v3088_v46 = vpop.permute.xlu1 %674 }
  0xaa   :  { %v3124_v61 = vpop.permute.xlu0 %659 }
  0xcd   :  { %v160_v3 = vpop.f32.mrf.mxu0  ;;  %v231_v4 = vpop.f32.mrf.mxu1 }
  0xce   :  { %v643_v11 = vmul.f32 %v628_v5, %v160_v3  ;;  %v645_v45 = vmul.f32 %v628_v5, %v231_v4  ;;  %v860_v3 = vld [vmem:[%s3907_s13 + $0x330] sm:$0xff]  ;;  %v3132_v4 = vpop.permute.xlu1 %677 }
  0xcf   :  { %v162_v6 = vpop.f32.mrf.mxu0  ;;  %v233_v7 = vpop.f32.mrf.mxu1 }
  0xd0   :  { %v644_v8 = vmul.f32 %v628_v5, %v162_v6  ;;  %v646_v9 = vmul.f32 %v628_v5, %v233_v7  ;;  %v640_v5 = vsel %vm90_vm0, %v2742_v53, %v2988_v60  ;;  %v843_v6 = vld [vmem:[%s3907_s13 + $0x2a8] sm:$0xff]  ;;  %v842_v60 = vld [vmem:[%s3907_s13 + $0x2a0] sm:$0xff] }
  0xd1   :  { %v875_v7 = vld [vmem:[%s3907_s13 + $0x3a8] sm:$0xff] }
  0xd2   :  { %1037 = vmatprep.mubr.f32.mxu1 %v644_v8  ;;  %1107 = vmatprep.mubr.f32.mxu0 %v646_v9  ;;  %v827_v8 = vld [vmem:[%s3907_s13 + $0x228] sm:$0xff]  ;;  %v874_v9 = vld [vmem:[%s3907_s13 + $0x3a0] sm:$0xff] }
  0xd3   :  { %1038 = vmatmul.mubr.f32.vlgmr.msra.gmra.mxu1 %v643_v11  ;;  %1108 = vmatmul.mubr.f32.vlgmr.msra.gmra.mxu0 %v645_v45  ;;  %v859_v53 = vld [vmem:[%s3907_s13 + $0x328] sm:$0xff]  ;;  %v641_v45 = vsel %vm625_vm4, %v640_v5, %v2992_v0  ;;  %v873_v0 = vld [vmem:[%s3907_s13 + $0x398] sm:$0xff]  ;;  %v914_v5 = vld [vmem:[%s3907_s13 + $0x4e0] sm:$0xff] }
  0xd4   :  { %2107 = vmatpush3.msra.mxu1 %v837_v12  ;;  %2142 = vmatpush3.msra.mxu0 %v869_v13  ;;  %v826_v12 = vld [vmem:[%s3907_s13 + $0x220] sm:$0xff] }
  0xd5   :  { %2108 = vmatprep.subr.mxu1 %v852_v15  ;;  %2143 = vmatprep.subr.mxu0 %v884_v16  ;;  %v858_v13 = vld [vmem:[%s3907_s13 + $0x320] sm:$0xff]  ;;  %v841_v15 = vld [vmem:[%s3907_s13 + $0x298] sm:$0xff]  ;;  %v3169_v16 = vpop.permute.xlu0 %662 }
  0xd6   :  { %2109 = vmatpush3.msra.mxu1 %v836_v18  ;;  %2144 = vmatpush3.msra.mxu0 %v868_v19  ;;  %v825_v18 = vld [vmem:[%s3907_s13 + $0x218] sm:$0xff] }
  0xd7   :  { %2110 = vmatprep.subr.mxu1 %v851_v20  ;;  %2145 = vmatprep.subr.mxu0 %v883_v21  ;;  %v3066_v37 = vpop.f32.mrf.mxu1  ;;  %v302_v11 = vpop.f32.mrf.mxu0  ;;  %v857_v19 = vld [vmem:[%s3907_s13 + $0x318] sm:$0xff]  ;;  %v642_v21 = vsel %vm627_vm5, %v641_v45, %v2995_v2  ;;  %v856_v2 = vld [vmem:[%s3907_s13 + $0x310] sm:$0xff] }
  0xd8   :  { %2111 = vmatpush3.msra.mxu1 %v835_v22  ;;  %2146 = vmatpush3.msra.mxu0 %v867_v23  ;;  %v3177_v20 = vpop.permute.xlu1 %680  ;;  %v840_v22 = vld [vmem:[%s3907_s13 + $0x290] sm:$0xff] }
  0xd9   :  { %2112 = vmatprep.subr.mxu1 %v850_v24  ;;  %2147 = vmatprep.subr.mxu0 %v882_v25  ;;  %v3096_v49 = vpop.f32.mrf.mxu1  ;;  %v872_v23 = vld [vmem:[%s3907_s13 + $0x390] sm:$0xff]  ;;  %v304_v24 = vpop.f32.mrf.mxu0 }
  0xda   :  { %2113 = vmatpush3.msra.mxu1 %v834_v27  ;;  %2148 = vmatpush3.msra.mxu0 %v866_v28  ;;  %v824_v25 = vld [vmem:[%s3907_s13 + $0x210] sm:$0xff]  ;;  %v839_v27 = vld [vmem:[%s3907_s13 + $0x288] sm:$0xff] }
  0xdb   :  { %2114 = vmatprep.subr.mxu1 %v849_v30  ;;  %2149 = vmatprep.subr.mxu0 %v881_v32  ;;  %v871_v28 = vld [vmem:[%s3907_s13 + $0x388] sm:$0xff]  ;;  %v648_v30 = vmul.f32 %v642_v21, %v304_v24 }
  0xdc   :  { %2115 = vmatpush3.msra.mxu1 %v833_v33  ;;  %2150 = vmatpush3.msra.mxu0 %v865_v34  ;;  %v823_v32 = vld [vmem:[%s3907_s13 + $0x208] sm:$0xff]  ;;  %v650_v34 = vmul.f32 %v642_v21, %v3096_v49  ;;  %v901_v49 = vld [vmem:[%s3907_s13 + $0x478] sm:$0xff] }
  0xdd   :  { %2116 = vmatprep.subr.mxu1 %v848_v35  ;;  %2151 = vmatprep.subr.mxu0 %v880_v36  ;;  %v855_v33 = vld [vmem:[%s3907_s13 + $0x308] sm:$0xff]  ;;  %v838_v35 = vld [vmem:[%s3907_s13 + $0x280] sm:$0xff]  ;;  %v3209_v36 = vpop.permute.xlu0 %728 }
  0xde   :  { %2117 = vmatpush3.msra.mxu1 %v832_v38  ;;  %2152 = vmatpush3.msra.mxu0 %v864_v39  ;;  %v870_v38 = vld [vmem:[%s3907_s13 + $0x380] sm:$0xff]  ;;  %v3214_v39 = vpop.permute.xlu1 %731 }
  0xdf   :  { %2118 = vmatprep.subr.mxu1 %v847_v40  ;;  %2153 = vmatprep.subr.mxu0 %v879_v41  ;;  %v822_v40 = vld [vmem:[%s3907_s13 + $0x200] sm:$0xff] }
  0xe0   :  { %2119 = vmatpush3.msra.mxu1 %v831_v43  ;;  %2154 = vmatpush3.msra.mxu0 %v863_v44  ;;  %v3110_v55 = vpop.f32.mrf.mxu1  ;;  %v854_v41 = vld [vmem:[%s3907_s13 + $0x300] sm:$0xff]  ;;  %v647_v43 = vmul.f32 %v642_v21, %v302_v11  ;;  %v649_v44 = vmul.f32 %v642_v21, %v3066_v37  ;;  %v933_v37 = vld [vmem:[%s3907_s13 + $0x578] sm:$0xff]  ;;  %v3314_v21 = vpop.f32.mrf.mxu0 }
  0xe1   :  { %2120 = vmatprep.subr.mxu1 %v846_v47  ;;  %2155 = vmatprep.subr.mxu0 %v878_v48  ;;  %v917_v47 = vld [vmem:[%s3907_s13 + $0x4f8] sm:$0xff] }
  0xe2   :  { %2121 = vmatpush3.msra.mxu1 %v830_v50  ;;  %2156 = vmatpush3.msra.mxu0 %v862_v51  ;;  %v2376_v62 = vpop.f32.mrf.mxu1  ;;  %v949_v48 = vld [vmem:[%s3907_s13 + $0x5f8] sm:$0xff]  ;;  %v706_v50 = vsel %vm538_vm3, %v2998_v10, %v3006_v14  ;;  %v916_v51 = vld [vmem:[%s3907_s13 + $0x4f0] sm:$0xff] }
  0xe3   :  { %2122 = vmatprep.subr.mxu1 %v845_v52  ;;  %2157 = vmatprep.subr.mxu0 %v877_v54  ;;  %v948_v52 = vld [vmem:[%s3907_s13 + $0x5f0] sm:$0xff]  ;;  %v3244_v54 = vpop.permute.xlu0 %734  ;;  %v708_v62 = vsel %vm707_vm6, %v706_v50, %v3046_v29  ;;  %v946_v29 = vld [vmem:[%s3907_s13 + $0x5e0] sm:$0xff]  ;;  %v897_v11 = vld [vmem:[%s3907_s13 + $0x458] sm:$0xff] }
  0xe4   :  { %2123 = vmatpush3.msra.mxu1 %v829_v56  ;;  %2158 = vmatpush3.msra.mxu0 %v861_v57  ;;  %v900_v56 = vld [vmem:[%s3907_s13 + $0x470] sm:$0xff]  ;;  %v3252_v57 = vpop.permute.xlu1 %683 }
  0xe5   :  { %2124 = vmatprep.subr.mxu1 %v844_v58  ;;  %2159 = vmatprep.subr.mxu0 %v876_v59  ;;  %v932_v14 = vld [vmem:[%s3907_s13 + $0x570] sm:$0xff]  ;;  %v915_v58 = vld [vmem:[%s3907_s13 + $0x4e8] sm:$0xff] }
  0xe6   :  { %2125 = vmatpush3.msra.mxu1 %v828_v1  ;;  %2160 = vmatpush3.msra.mxu0 %v860_v3  ;;  %v947_v59 = vld [vmem:[%s3907_s13 + $0x5e8] sm:$0xff] }
  0xe7   :  { %2126 = vmatprep.subr.mxu1 %v843_v6  ;;  %2161 = vmatprep.subr.mxu0 %v875_v7  ;;  %v899_v1 = vld [vmem:[%s3907_s13 + $0x468] sm:$0xff]  ;;  %v898_v6 = vld [vmem:[%s3907_s13 + $0x460] sm:$0xff] }
  0xe8   :  { %2127 = vmatpush3.msra.mxu1 %v827_v8  ;;  %2162 = vmatpush3.msra.mxu0 %v859_v53  ;;  %v931_v3 = vld [vmem:[%s3907_s13 + $0x568] sm:$0xff]  ;;  %v930_v7 = vld [vmem:[%s3907_s13 + $0x560] sm:$0xff]  ;;  %v709_v8 = vsel %vm625_vm4, %v708_v62, %v3088_v46  ;;  %v913_v53 = vld [vmem:[%s3907_s13 + $0x4d8] sm:$0xff]  ;;  %v3293_v45 = vpop.permute.xlu1 %686 }
  0xe9   :  { %2128 = vmatprep.subr.mxu1 %v842_v60  ;;  %2163 = vmatprep.subr.mxu0 %v874_v9  ;;  %v945_v60 = vld [vmem:[%s3907_s13 + $0x5d8] sm:$0xff]  ;;  %v738_v9 = vpop.permute.xlu0 %737 }
  0xea   :  { %2129 = vmatpush3.msra.mxu1 %v826_v12  ;;  %2164 = vmatpush3.msra.mxu0 %v858_v13  ;;  %v929_v46 = vld [vmem:[%s3907_s13 + $0x558] sm:$0xff]  ;;  %v912_v12 = vld [vmem:[%s3907_s13 + $0x4d0] sm:$0xff] }
  0xeb   :  { %2130 = vmatprep.subr.mxu1 %v841_v15  ;;  %2165 = vmatprep.subr.mxu0 %v873_v0  ;;  %v944_v13 = vld [vmem:[%s3907_s13 + $0x5d0] sm:$0xff]  ;;  %v711_v15 = vsel %vm710_vm7, %v709_v8, %v3132_v4  ;;  %v749_v0 = vsel %vm538_vm3, %v2891_v31, %v3209_v36  ;;  %v911_v4 = vld [vmem:[%s3907_s13 + $0x4c8] sm:$0xff]  ;;  %v941_v36 = vld [vmem:[%s3907_s13 + $0x5b8] sm:$0xff] }
  0xec   :  { %2131 = vmatpush3.msra.mxu1 %v825_v18  ;;  %2166 = vmatpush3.msra.mxu0 %v857_v19  ;;  %v896_v18 = vld [vmem:[%s3907_s13 + $0x450] sm:$0xff]  ;;  %v943_v31 = vld [vmem:[%s3907_s13 + $0x5c8] sm:$0xff]  ;;  %v750_v24 = vsel %vm90_vm0, %v749_v0, %v3214_v39  ;;  %v921_v8 = vld [vmem:[%s3907_s13 + $0x518] sm:$0xff] }
  0xed   :  { %2132 = vmatprep.subr.mxu1 %v840_v22  ;;  %2167 = vmatprep.subr.mxu0 %v872_v23  ;;  %v928_v19 = vld [vmem:[%s3907_s13 + $0x550] sm:$0xff]  ;;  %v895_v22 = vld [vmem:[%s3907_s13 + $0x448] sm:$0xff] }
  0xee   :  { %2133 = vmatpush3.msra.mxu1 %v824_v25  ;;  %2168 = vmatpush3.msra.mxu0 %v856_v2  ;;  %v927_v23 = vld [vmem:[%s3907_s13 + $0x548] sm:$0xff]  ;;  %v910_v25 = vld [vmem:[%s3907_s13 + $0x4c0] sm:$0xff] }
  0xef   :  { %2134 = vmatprep.subr.mxu1 %v839_v27  ;;  %2169 = vmatprep.subr.mxu0 %v871_v28  ;;  %v942_v2 = vld [vmem:[%s3907_s13 + $0x5c0] sm:$0xff]  ;;  %v460_v27 = vpop.f32.mrf.mxu0  ;;  %v713_v28 = vsel %vm712_vm8, %v711_v15, %v3177_v20  ;;  %v608_v15 = vpop.f32.mrf.mxu1 }
  0xf0   :  { %2135 = vmatpush3.msra.mxu1 %v823_v32  ;;  %2170 = vmatpush3.msra.mxu0 %v855_v33  ;;  %v894_v32 = vld [vmem:[%s3907_s13 + $0x440] sm:$0xff]  ;;  %v724_v39 = vmul.f32 %v713_v28, %v460_v27  ;;  %v965_v28 = vld [vmem:[%s3907_s13 + $0x678] sm:$0xff] }
  0xf1   :  { %2136 = vmatprep.subr.mxu1 %v838_v35  ;;  %1177 = vmatprep.mubr.f32.mxu1 %v648_v30  ;;  %v741_v30 = vpop.permute.xlu0 %740  ;;  %v926_v33 = vld [vmem:[%s3907_s13 + $0x540] sm:$0xff]  ;;  %v909_v35 = vld [vmem:[%s3907_s13 + $0x4b8] sm:$0xff] }
  0xf2   :  { %2171 = vmatprep.subr.mxu0 %v870_v38  ;;  %1247 = vmatprep.mubr.f32.mxu0 %v650_v34  ;;  %v690_v34 = vpop.permute.xlu1 %689  ;;  %v751_v38 = vsel %vm699_vm10, %v750_v24, %v3244_v54  ;;  %v939_v54 = vld [vmem:[%s3907_s13 + $0x5a8] sm:$0xff]  ;;  %v918_v27 = vld [vmem:[%s3907_s13 + $0x500] sm:$0xff] }
  0xf3   :  { %2137 = vmatpush3.msra.mxu1 %v822_v40  ;;  %2172 = vmatpush3.msra.mxu0 %v854_v41  ;;  %v893_v40 = vld [vmem:[%s3907_s13 + $0x438] sm:$0xff] }
  0xf4   :  { %1178 = vmatmul.mubr.f32.vlgmr.msra.gmra.mxu1 %v647_v43  ;;  %1248 = vmatmul.mubr.f32.vlgmr.msra.gmra.mxu0 %v649_v44  ;;  %v925_v41 = vld [vmem:[%s3907_s13 + $0x538] sm:$0xff]  ;;  %v698_v43 = vsel %vm388_vm1, %v2781_v63, %v3038_v26  ;;  %v715_v44 = vsel %vm714_vm9, %v3177_v20, %v3252_v57  ;;  %v940_v63 = vld [vmem:[%s3907_s13 + $0x5b0] sm:$0xff]  ;;  %v752_v26 = vsel %vm625_vm4, %v751_v38, %v738_v9  ;;  %v907_v20 = vld [vmem:[%s3907_s13 + $0x4a8] sm:$0xff] }
  0xf5   :  { %2176 = vmatprep.subr.mxu1 %v917_v47  ;;  %2211 = vmatprep.subr.mxu0 %v949_v48  ;;  %v908_v47 = vld [vmem:[%s3907_s13 + $0x4b0] sm:$0xff]  ;;  %v700_v50 = vsel %vm699_vm10, %v698_v43, %v3080_v42  ;;  %v906_v42 = vld [vmem:[%s3907_s13 + $0x4a0] sm:$0xff]  ;;  %v753_v57 = vsel %vm719_vm11, %v752_v26, %v741_v30  ;;  %v1467_v26 = vld [vmem:[%s3904_s10 + $0x18] sm:$0xff] }
  0xf6   :  { %2177 = vmatpush3.msra.mxu1 %v901_v49  ;;  %2212 = vmatpush3.msra.mxu0 %v933_v37  ;;  %v892_v48 = vld [vmem:[%s3907_s13 + $0x430] sm:$0xff]  ;;  %v744_v37 = vpop.permute.xlu0 %743  ;;  %v702_v62 = vsel %vm701_vm12, %v700_v50, %v3124_v61  ;;  %v937_v61 = vld [vmem:[%s3907_s13 + $0x598] sm:$0xff]  ;;  %v962_v30 = vld [vmem:[%s3907_s13 + $0x660] sm:$0xff] }
  0xf7   :  { %2178 = vmatprep.subr.mxu1 %v916_v51  ;;  %2213 = vmatprep.subr.mxu0 %v948_v52  ;;  %v924_v49 = vld [vmem:[%s3907_s13 + $0x530] sm:$0xff]  ;;  %v716_v51 = vsel %vm90_vm0, %v715_v44, %v3293_v45  ;;  %v891_v52 = vld [vmem:[%s3907_s13 + $0x428] sm:$0xff] }
  0xf8   :  { %2179 = vmatpush3.msra.mxu1 %v900_v56  ;;  %2214 = vmatpush3.msra.mxu0 %v932_v14  ;;  %v693_v56 = vpop.permute.xlu1 %692  ;;  %v923_v14 = vld [vmem:[%s3907_s13 + $0x528] sm:$0xff]  ;;  %v956_v38 = vld [vmem:[%s3907_s13 + $0x630] sm:$0xff] }
  0xf9   :  { %2180 = vmatprep.subr.mxu1 %v915_v58  ;;  %2215 = vmatprep.subr.mxu0 %v947_v59  ;;  %v890_v58 = vld [vmem:[%s3907_s13 + $0x420] sm:$0xff]  ;;  %v952_v43 = vld [vmem:[%s3907_s13 + $0x610] sm:$0xff]  ;;  %v951_v44 = vld [vmem:[%s3907_s13 + $0x608] sm:$0xff] }
  0xfa   :  { %2181 = vmatpush3.msra.mxu1 %v899_v1  ;;  %2216 = vmatpush3.msra.mxu0 %v931_v3  ;;  %v938_v59 = vld [vmem:[%s3907_s13 + $0x5a0] sm:$0xff]  ;;  %v718_v1 = vsel %vm717_vm13, %v716_v51, %v690_v34  ;;  %v905_v3 = vld [vmem:[%s3907_s13 + $0x498] sm:$0xff]  ;;  %v959_v34 = vld [vmem:[%s3907_s13 + $0x648] sm:$0xff] }
  0xfb   :  { %2182 = vmatprep.subr.mxu1 %v914_v5  ;;  %2217 = vmatprep.subr.mxu0 %v946_v29  ;;  %v922_v5 = vld [vmem:[%s3907_s13 + $0x520] sm:$0xff]  ;;  %v889_v29 = vld [vmem:[%s3907_s13 + $0x418] sm:$0xff]  ;;  %v720_v9 = vsel %vm719_vm11, %v718_v1, %v693_v56 }
  0xfc   :  { %2183 = vmatpush3.msra.mxu1 %v898_v6  ;;  %2218 = vmatpush3.msra.mxu0 %v930_v7  ;;  %v754_v6 = vsel %vm627_vm5, %v753_v57, %v744_v37  ;;  %v904_v7 = vld [vmem:[%s3907_s13 + $0x490] sm:$0xff]  ;;  %v696_v45 = vpop.permute.xlu1 %695  ;;  %v1464_v37 = vld [vmem:[%s3904_s10] sm:$0xff] }
  0xfd   :  { %2184 = vmatprep.subr.mxu1 %v913_v53  ;;  %2219 = vmatprep.subr.mxu0 %v945_v60  ;;  %v747_v53 = vpop.permute.xlu0 %746  ;;  %v703_v60 = vsel %vm627_vm5, %v702_v62, %v3169_v16  ;;  %v903_v16 = vld [vmem:[%s3907_s13 + $0x488] sm:$0xff] }
  0xfe   :  { %2185 = vmatpush3.msra.mxu1 %v897_v11  ;;  %2220 = vmatpush3.msra.mxu0 %v929_v46  ;;  %v888_v11 = vld [vmem:[%s3907_s13 + $0x410] sm:$0xff]  ;;  %v3440_v0 = vsel %vm712_vm8, %v754_v6, %v747_v53 }
  0xff   :  { %2186 = vmatprep.subr.mxu1 %v912_v12  ;;  %2221 = vmatprep.subr.mxu0 %v944_v13  ;;  %v936_v46 = vld [vmem:[%s3907_s13 + $0x590] sm:$0xff]  ;;  %v887_v13 = vld [vmem:[%s3907_s13 + $0x408] sm:$0xff]  ;;  %v756_v24 = vmul.f32 %v3440_v0, %v608_v15  ;;  %v3560_v15 = vld [vmem:[%s3908_s14 + $0xf8] sm:$0xff] }
 0x100   :  { %2187 = vmatpush3.msra.mxu1 %v896_v18  ;;  %2222 = vmatpush3.msra.mxu0 %v928_v19  ;;  %v920_v12 = vld [vmem:[%s3907_s13 + $0x510] sm:$0xff]  ;;  %v935_v18 = vld [vmem:[%s3907_s13 + $0x588] sm:$0xff]  ;;  %v705_v19 = vsel %vm704_vm14, %v703_v60, %v2998_v10  ;;  %v934_v10 = vld [vmem:[%s3907_s13 + $0x580] sm:$0xff] }
 0x101   :  { %2188 = vmatprep.subr.mxu1 %v911_v4  ;;  %2223 = vmatprep.subr.mxu0 %v943_v31  ;;  %v722_v4 = vsel %vm721_vm15, %v720_v9, %v696_v45  ;;  %v902_v31 = vld [vmem:[%s3907_s13 + $0x480] sm:$0xff] }
 0x102   :  { %2189 = vmatpush3.msra.mxu1 %v895_v22  ;;  %2224 = vmatpush3.msra.mxu0 %v927_v23  ;;  %v919_v22 = vld [vmem:[%s3907_s13 + $0x508] sm:$0xff]  ;;  %v886_v23 = vld [vmem:[%s3907_s13 + $0x400] sm:$0xff] }
 0x103   :  { %2190 = vmatprep.subr.mxu1 %v910_v25  ;;  %2225 = vmatprep.subr.mxu0 %v942_v2  ;;  %v723_v25 = vmul.f32 %v705_v19, %v3314_v21  ;;  %v725_v2 = vmul.f32 %v722_v4, %v3110_v55  ;;  %v964_v55 = vld [vmem:[%s3907_s13 + $0x670] sm:$0xff]  ;;  %v963_v21 = vld [vmem:[%s3907_s13 + $0x668] sm:$0xff] }
 0x104   :  { %2191 = vmatpush3.msra.mxu1 %v894_v32  ;;  %2226 = vmatpush3.msra.mxu0 %v926_v33  ;;  %v961_v32 = vld [vmem:[%s3907_s13 + $0x658] sm:$0xff]  ;;  %v960_v33 = vld [vmem:[%s3907_s13 + $0x650] sm:$0xff]  ;;  %v3586_v4 = vld [vmem:[%s3908_s14 + $0xe8] sm:$0xff] }
 0x105   :  { %2192 = vmatprep.subr.mxu1 %v909_v35  ;;  %2227 = vmatprep.subr.mxu0 %v941_v36  ;;  %v958_v35 = vld [vmem:[%s3907_s13 + $0x640] sm:$0xff]  ;;  %v957_v36 = vld [vmem:[%s3907_s13 + $0x638] sm:$0xff]  ;;  %v3577_v19 = vld [vmem:[%s3908_s14 + $0x70] sm:$0xff] }
 0x106   :  { %2193 = vmatpush3.msra.mxu1 %v893_v40  ;;  %2228 = vmatpush3.msra.mxu0 %v925_v41  ;;  %v954_v40 = vld [vmem:[%s3907_s13 + $0x620] sm:$0xff]  ;;  %v953_v41 = vld [vmem:[%s3907_s13 + $0x618] sm:$0xff] }
 0x107   :  { %2194 = vmatprep.subr.mxu1 %v908_v47  ;;  %1317 = vmatprep.mubr.f32.mxu1 %v724_v39  ;;  %v955_v39 = vld [vmem:[%s3907_s13 + $0x628] sm:$0xff]  ;;  %v610_v47 = vpop.f32.mrf.mxu1 }
 0x108   :  { %2195 = vmatpush3.msra.mxu1 %v892_v48  ;;  %2229 = vmatprep.subr.mxu0 %v940_v63  ;;  %v950_v48 = vld [vmem:[%s3907_s13 + $0x600] sm:$0xff]  ;;  %v757_v63 = vmul.f32 %v3440_v0, %v610_v47  ;;  %v3565_v0 = vld [vmem:[%s3908_s14 + $0x78] sm:$0xff]  ;;  %v3738_v47 = vld [vmem:[%s3908_s14 + $0x88] sm:$0xff] }
 0x109   :  { %2196 = vmatprep.subr.mxu1 %v907_v20  ;;  %2230 = vmatpush3.msra.mxu0 %v924_v49  ;;  %v1466_v20 = vld [vmem:[%s3904_s10 + $0x10] sm:$0xff]  ;;  %v1465_v49 = vld [vmem:[%s3904_s10 + $0x8] sm:$0xff] }
 0x10a   :  { %2197 = vmatpush3.msra.mxu1 %v891_v52  ;;  %2231 = vmatprep.subr.mxu0 %v939_v54 }
 0x10b   :  { %2198 = vmatprep.subr.mxu1 %v906_v42  ;;  %2232 = vmatpush3.msra.mxu0 %v923_v14  ;;  %v2025_v42 = vld [vmem:[%s3909_s15] ss:$0 sm:$0xff] }
 0x10c   :  { %2199 = vmatpush3.msra.mxu1 %v890_v58  ;;  %2233 = vmatprep.subr.mxu0 %v938_v59 }
 0x10d   :  { %2200 = vmatprep.subr.mxu1 %v905_v3  ;;  %2234 = vmatpush3.msra.mxu0 %v922_v5 }
 0x10e   :  { %2201 = vmatpush3.msra.mxu1 %v889_v29  ;;  %2235 = vmatprep.subr.mxu0 %v937_v61 }
 0x10f   :  { %2202 = vmatprep.subr.mxu1 %v904_v7  ;;  %2236 = vmatpush3.msra.mxu0 %v921_v8 }
 0x110   :  { %2203 = vmatpush3.msra.mxu1 %v888_v11  ;;  %2237 = vmatprep.subr.mxu0 %v936_v46 }
 0x111   :  { %2204 = vmatprep.subr.mxu1 %v903_v16  ;;  %2238 = vmatpush3.msra.mxu0 %v920_v12 }
 0x112   :  { %2205 = vmatpush3.msra.mxu1 %v887_v13  ;;  %2239 = vmatprep.subr.mxu0 %v935_v18  ;;  %v3571_v18 = vld [vmem:[%s3908_s14 + $0xf0] sm:$0xff] }
 0x113   :  { %2206 = vmatprep.subr.mxu1 %v902_v31  ;;  %2240 = vmatpush3.msra.mxu0 %v919_v22  ;;  %v3593_v31 = vld [vmem:[%s3908_s14 + $0x68] sm:$0xff]  ;;  %v3599_v22 = vld [vmem:[%s3908_s14 + $0xe0] sm:$0xff] }
 0x114   :  { %2207 = vmatpush3.msra.mxu1 %v886_v23  ;;  %2241 = vmatprep.subr.mxu0 %v934_v10  ;;  %v3608_v23 = vld [vmem:[%s3908_s14 + $0x60] sm:$0xff]  ;;  %v3614_v10 = vld [vmem:[%s3908_s14 + $0xd8] sm:$0xff] }
 0x115   :  { %1318 = vmatmul.mubr.f32.vlgmr.msra.gmra.mxu1 %v723_v25  ;;  %2377 = vmatprep.subr.mxu1 %v2452_v17  ;;  %v3626_v25 = vld [vmem:[%s3908_s14 + $0xd0] sm:$0xff] }
 0x116   :  { %2242 = vmatpush3.msra.mxu0 %v918_v27  ;;  %1387 = vmatprep.mubr.f32.mxu0 %v756_v24  ;;  %v3620_v24 = vld [vmem:[%s3908_s14 + $0x58] sm:$0xff]  ;;  %v3640_v27 = vld [vmem:[%s3908_s14 + $0xc8] sm:$0xff] }
 0x117   :  { %2378 = vmatpush3.msra.mxu1 %v965_v28  ;;  %1388 = vmatmul.mubr.f32.vlgmr.msra.gmra.mxu0 %v725_v2  ;;  %v3634_v2 = vld [vmem:[%s3908_s14 + $0x50] sm:$0xff]  ;;  %v3646_v28 = vld [vmem:[%s3908_s14 + $0x48] sm:$0xff] }
 0x118   :  { %2379 = vmatprep.subr.mxu1 %v2452_v17  ;;  %2409 = vmatprep.mubr.msk.f32.mxu1 %vm2453_vm2, %v2452_v17 }
 0x119   :  { %2380 = vmatpush3.msra.mxu1 %v964_v55  ;;  %1535 = vmatprep.mubr.f32.mxu0 %v2452_v17  ;;  %v3652_v55 = vld [vmem:[%s3908_s14 + $0xc0] sm:$0xff] }
 0x11a   :  { %2381 = vmatprep.subr.mxu1 %v2452_v17  ;;  %1499 = vmatprep.subr.mxu0 %v1467_v26  ;;  %v3755_v26 = vld [vmem:[%s3908_s14] sm:$0xff] }
 0x11b   :  { %2382 = vmatpush3.msra.mxu1 %v963_v21  ;;  %1500 = vmatpush1.msra.mxu0 %v1466_v20  ;;  %v3658_v21 = vld [vmem:[%s3908_s14 + $0x40] sm:$0xff] }
 0x11c   :  { %2383 = vmatprep.subr.mxu1 %v2452_v17  ;;  %1501 = vmatprep.subr.mxu0 %v1465_v49 }
 0x11d   :  { %2384 = vmatpush3.msra.mxu1 %v962_v30  ;;  %1502 = vmatpush1.msra.mxu0 %v1464_v37  ;;  %v3664_v30 = vld [vmem:[%s3908_s14 + $0xb8] sm:$0xff] }
 0x11e   :  { %2385 = vmatprep.subr.mxu1 %v2452_v17  ;;  %2263 = vmatprep.subr.mxu0 %v3560_v15 }
 0x11f   :  { %2386 = vmatpush3.msra.mxu1 %v961_v32  ;;  %v3670_v32 = vld [vmem:[%s3908_s14 + $0x38] sm:$0xff] }
 0x120   :  { %2387 = vmatprep.subr.mxu1 %v2452_v17 }
 0x121   :  { %2388 = vmatpush3.msra.mxu1 %v960_v33  ;;  %v3676_v33 = vld [vmem:[%s3908_s14 + $0xb0] sm:$0xff] }
 0x122   :  { %2389 = vmatprep.subr.mxu1 %v2452_v17 }
 0x123   :  { %2390 = vmatpush3.msra.mxu1 %v959_v34  ;;  %v3682_v34 = vld [vmem:[%s3908_s14 + $0x30] sm:$0xff] }
 0x124   :  { %2391 = vmatprep.subr.mxu1 %v2452_v17 }
 0x125   :  { %2392 = vmatpush3.msra.mxu1 %v958_v35  ;;  %v3688_v35 = vld [vmem:[%s3908_s14 + $0xa8] sm:$0xff] }
 0x126   :  { %2393 = vmatprep.subr.mxu1 %v2452_v17 }
 0x127   :  { %2394 = vmatpush3.msra.mxu1 %v957_v36  ;;  %v3694_v36 = vld [vmem:[%s3908_s14 + $0x28] sm:$0xff] }
 0x128   :  { %2395 = vmatprep.subr.mxu1 %v2452_v17 }
 0x129   :  { %2396 = vmatpush3.msra.mxu1 %v956_v38  ;;  %v3700_v38 = vld [vmem:[%s3908_s14 + $0xa0] sm:$0xff] }
 0x12a   :  { %2397 = vmatprep.subr.mxu1 %v2452_v17 }
 0x12b   :  { %2398 = vmatpush3.msra.mxu1 %v955_v39  ;;  %v3706_v39 = vld [vmem:[%s3908_s14 + $0x20] sm:$0xff] }
 0x12c   :  { %2399 = vmatprep.subr.mxu1 %v2452_v17 }
 0x12d   :  { %2400 = vmatpush3.msra.mxu1 %v954_v40  ;;  %v3712_v40 = vld [vmem:[%s3908_s14 + $0x98] sm:$0xff] }
 0x12e   :  { %2401 = vmatprep.subr.mxu1 %v2452_v17 }
 0x12f   :  { %2402 = vmatpush3.msra.mxu1 %v953_v41  ;;  %v3718_v41 = vld [vmem:[%s3908_s14 + $0x18] sm:$0xff] }
 0x130   :  { %2403 = vmatprep.subr.mxu1 %v2452_v17 }
 0x131   :  { %2404 = vmatpush3.msra.mxu1 %v952_v43  ;;  %v3726_v43 = vld [vmem:[%s3908_s14 + $0x90] sm:$0xff] }
 0x132   :  { %2405 = vmatprep.subr.mxu1 %v2452_v17 }
 0x133   :  { %2406 = vmatpush3.msra.mxu1 %v951_v44  ;;  %v3732_v44 = vld [vmem:[%s3908_s14 + $0x10] sm:$0xff] }
 0x134   :  { %2407 = vmatprep.subr.mxu1 %v2452_v17 }
 0x135   :  { %2408 = vmatpush3.msra.mxu1 %v950_v48  ;;  %v3744_v48 = vld [vmem:[%s3908_s14 + $0x8] sm:$0xff] }
 0x136   :  { %2410 = vmatmul.mubr.f32.vlgmr.msra.gmra.mxu1 %v757_v63  ;;  %v3750_v63 = vld [vmem:[%s3908_s14 + $0x80] sm:$0xff] }
 0x137   :  { %1750 = vmatprep.mubr.f32.mxu1 %v2452_v17 }
 0x193   :  { %v2068_v50 = vpop.f32.mrf.mxu1  ;;  %v2103_v51 = vpop.f32.mrf.mxu0 }
 0x195   :  { %v2069_v52 = vpop.f32.mrf.mxu1  ;;  %v2104_v14 = vpop.f32.mrf.mxu0 }
 0x196   :  { %v2070_v56 = vadd.f32 %v2069_v52, %v2068_v50  ;;  %v2105_v1 = vadd.f32 %v2104_v14, %v2103_v51 }
 0x198   :  { %v1040_v59 = vadd.f32 %v2070_v56, %v2025_v42 }
 0x19a   :  { %v1110_v29 = vadd.f32 %v2105_v1, %v1040_v59 }
 0x1b4   :  { %v2138_v54 = vpop.f32.mrf.mxu1  ;;  %v2173_v57 = vpop.f32.mrf.mxu0 }
 0x1b6   :  { %v2139_v58 = vpop.f32.mrf.mxu1  ;;  %v2174_v5 = vpop.f32.mrf.mxu0 }
 0x1b7   :  { %v2140_v3 = vadd.f32 %v2139_v58, %v2138_v54  ;;  %v2175_v8 = vadd.f32 %v2174_v5, %v2173_v57 }
 0x1b9   :  { %v1180_v7 = vadd.f32 %v2140_v3, %v1110_v29 }
 0x1bb   :  { %v1250_v9 = vadd.f32 %v2175_v8, %v1180_v7 }
 0x1d5   :  { %v2208_v62 = vpop.f32.mrf.mxu1 }
 0x1d7   :  { %v2209_v61 = vpop.f32.mrf.mxu1  ;;  %v2243_v6 = vpop.f32.mrf.mxu0 }
 0x1d8   :  { %v2210_v53 = vadd.f32 %v2209_v61, %v2208_v62 }
 0x1d9   :  { %v2244_v60 = vpop.f32.mrf.mxu0 }
 0x1da   :  { %v1320_v11 = vadd.f32 %v2210_v53, %v1250_v9  ;;  %v2245_v46 = vadd.f32 %v2244_v60, %v2243_v6 }
 0x1dc   :  { %v1390_v45 = vadd.f32 %v2245_v46, %v1320_v11 }
 0x1f6   :  { %v1459_v16 = vpop.f32.mrf.mxu1 }
 0x1f7   :  { %v3549_v12 = vadd.f32 %v1459_v16, %v1390_v45 }
 0x1f8   :  { %v2411_v13 = vpop.f32.mrf.mxu1 }
 0x1f9   :  { %1545 = vrot.lane.b32.xlu1 %v3549_v12, %s2458_s21  ;;  %1542 = vrot.lane.b32.xlu0 %v3549_v12, %s2464_s24  ;;  %s2469_s21 = smov [#allocation2]  }
 0x1fa   :  { %2026 = vmatmul.mubr.msk.f32.vlgmr.msra.gmra.mxu0 %vm538_vm3, %v3549_v12  ;;  %s2010_s24 = sshll.u32 %s2469_s21, 4  ;;  %s2011_s24 = int_to_ptr.vmem [resolvable:$true] %s2010_s24 }
 0x1fb   :  { %2264 = vmatpush3.msra.mxu0 %v3565_v0  ;;  %s2430_s30 = scalar_lea.vmem %s2011_s24, 32  ;;  %p2435_p1 = scmp.lt.s32.totalorder %s2011_s24, %s2011_s24 }
 0x1fc   :  { %2265 = vmatprep.subr.mxu0 %v3571_v18  ;;  %p2431_p0 = scmp.ne.s32.totalorder %s2011_s24, %s2430_s30  ;;  %p2436_p2 = scmp.lt.s32.totalorder %s2430_s30, %s2430_s30 }
 0x1fd   :  { %1551 = vrot.lane.b32.xlu1 %v3549_v12, %s2461_s23  ;;  %1548 = vrot.lane.b32.xlu0 %v3549_v12, %s2454_s28 }
 0x1fe   :  { %2266 = vmatpush3.msra.mxu0 %v3577_v19  ;;  %p2437_p3 = por %p2436_p2, %p2435_p1 }
 0x1ff   :  { %2267 = vmatprep.subr.mxu0 %v3586_v4 }
 0x200   :  { %2268 = vmatpush3.msra.mxu0 %v3593_v31  ;;  %p2438_p4 = pnand %p2437_p3, %p2431_p0 }
 0x201   :  { %1557 = vrot.lane.b32.xlu1 %v3549_v12, %s2466_s4  ;;  %1554 = vrot.lane.b32.xlu0 %v3549_v12, %s2456_s3 }
 0x202   :  { %2269 = vmatprep.subr.mxu0 %v3599_v22 }
 0x203   :  { %2270 = vmatpush3.msra.mxu0 %v3608_v23 }
 0x204   :  { %2271 = vmatprep.subr.mxu0 %v3614_v10 }
 0x205   :  { %1560 = vrot.lane.b32.xlu0 %v3549_v12, %s2455_s19  ;;  %2272 = vmatpush3.msra.mxu0 %v3620_v24 }
 0x206   :  { %2273 = vmatprep.subr.mxu0 %v3626_v25 }
 0x207   :  { %2274 = vmatpush3.msra.mxu0 %v3634_v2 }
 0x208   :  { %2275 = vmatprep.subr.mxu0 %v3640_v27 }
 0x209   :  { %2276 = vmatpush3.msra.mxu0 %v3646_v28 }
 0x20a   :  { %2277 = vmatprep.subr.mxu0 %v3652_v55 }
 0x20b   :  { %2278 = vmatpush3.msra.mxu0 %v3658_v21 }
 0x20c   :  { %2279 = vmatprep.subr.mxu0 %v3664_v30 }
 0x20d   :  { %2280 = vmatpush3.msra.mxu0 %v3670_v32 }
 0x20e   :  { %2281 = vmatprep.subr.mxu0 %v3676_v33 }
 0x20f   :  { %2282 = vmatpush3.msra.mxu0 %v3682_v34 }
 0x210   :  { %2283 = vmatprep.subr.mxu0 %v3688_v35 }
 0x211   :  { %2284 = vmatpush3.msra.mxu0 %v3694_v36 }
 0x212   :  { %2285 = vmatprep.subr.mxu0 %v3700_v38 }
 0x213   :  { %2286 = vmatpush3.msra.mxu0 %v3706_v39 }
 0x214   :  { %2287 = vmatprep.subr.mxu0 %v3712_v40 }
 0x215   :  { %2288 = vmatpush3.msra.mxu0 %v3718_v41 }
 0x216   :  { %2289 = vmatprep.subr.mxu0 %v3726_v43 }
 0x217   :  { %2290 = vmatpush3.msra.mxu0 %v3732_v44 }
 0x218   :  { %2291 = vmatprep.subr.mxu0 %v3738_v47 }
 0x219   :  { %2292 = vmatpush3.msra.mxu0 %v3744_v48 }
 0x21a   :  { %2293 = vmatprep.subr.mxu0 %v3750_v63 }
 0x21b   :  { %2294 = vmatpush3.msra.mxu0 %v3755_v26 }
 0x26b   :  { %v1546_v20 = vpop.permute.xlu1 %1545  ;;  %v1543_v49 = vpop.permute.xlu0 %1542 }
 0x26c   :  { %v1563_v8 = vsel %vm538_vm3, %v1543_v49, %v3549_v12 }
 0x26d   :  { %v1564_v53 = vsel %vm90_vm0, %v1563_v8, %v1546_v20 }
 0x26f   :  { %v1549_v37 = vpop.permute.xlu0 %1548  ;;  %v1552_v50 = vpop.permute.xlu1 %1551 }
 0x270   :  { %v1565_v60 = vsel %vm699_vm10, %v1564_v53, %v1549_v37 }
 0x271   :  { %v1566_v9 = vsel %vm625_vm4, %v1565_v60, %v1552_v50 }
 0x273   :  { %v1555_v51 = vpop.permute.xlu0 %1554  ;;  %v1558_v52 = vpop.permute.xlu1 %1557 }
 0x274   :  { %v1567_v11 = vsel %vm719_vm11, %v1566_v9, %v1555_v51 }
 0x275   :  { %v1568_v45 = vsel %vm627_vm5, %v1567_v11, %v1558_v52 }
 0x277   :  { %v1561_v54 = vpop.permute.xlu0 %1560 }
 0x278   :  { %v1757_v56 = vsel %vm538_vm3, %v1561_v54, %v1543_v49  ;;  %v1919_v42 = vsel %vm538_vm3, %v1558_v52, %v1561_v54  ;;  %v1569_v16 = vsel %vm712_vm8, %v1568_v45, %v1561_v54 }
 0x279   :  { %v1758_v14 = vsel %vm90_vm0, %v1757_v56, %v3549_v12  ;;  %v1920_v57 = vsel %vm90_vm0, %v1919_v42, %v1543_v49  ;;  %v1680_v49 = vld [vmem:[%s3905_s11 + $0x8] sm:$0xff]  ;;  %vm2002_vm0 = vcmask 123904  }
 0x27a   :  { %v1759_v58 = vsel %vm699_vm10, %v1758_v14, %v1546_v20  ;;  %v1921_v59 = vsel %vm699_vm10, %v1920_v57, %v3549_v12  ;;  %v1682_v12 = vld [vmem:[%s3905_s11 + $0x18] sm:$0xff] }
 0x27b   :  { %v1760_v62 = vsel %vm625_vm4, %v1759_v58, %v1549_v37  ;;  %v1922_v1 = vsel %vm625_vm4, %v1921_v59, %v1546_v20  ;;  %1714 = vmatprep.subr.mxu1 %v1682_v12  ;;  %v1681_v20 = vld [vmem:[%s3905_s11 + $0x10] sm:$0xff] }
 0x27c   :  { %v1761_v3 = vsel %vm719_vm11, %v1760_v62, %v1552_v50  ;;  %v1923_v5 = vsel %vm719_vm11, %v1922_v1, %v1549_v37  ;;  %1715 = vmatpush1.msra.mxu1 %v1681_v20  ;;  %v1679_v37 = vld [vmem:[%s3905_s11] sm:$0xff]  ;;  %v1844_v62 = vld [vmem:[%s3906_s12 + $0x18] sm:$0xff]  ;;  %v1843_v1 = vld [vmem:[%s3906_s12 + $0x10] sm:$0xff] }
 0x27d   :  { %v1762_v29 = vsel %vm627_vm5, %v1761_v3, %v1555_v51  ;;  %v1924_v61 = vsel %vm627_vm5, %v1923_v5, %v1552_v50  ;;  %1716 = vmatprep.subr.mxu1 %v1680_v49  ;;  %v2027_v50 = vld [vmem:[%s3910_s16] ss:$0 sm:$0xff]  ;;  %1876 = vmatprep.subr.mxu0 %v1844_v62  ;;  %v1842_v3 = vld [vmem:[%s3906_s12 + $0x8] sm:$0xff] }
 0x27e   :  { %v3774_v6 = vsel %vm712_vm8, %v1762_v29, %v1558_v52  ;;  %v3777_v7 = vsel %vm712_vm8, %v1924_v61, %v1555_v51  ;;  %1717 = vmatpush1.msra.mxu1 %v1679_v37  ;;  %v1841_v5 = vld [vmem:[%s3906_s12] sm:$0xff] }
 0x27f   :  { %2298 = vmatprep.subr.mxu1 %v3560_v15  ;;  %v2029_v61 = vld [vmem:[%s3910_s16 + $0x1] ss:$0 sm:$0xff] }
 0x2ba   :  { %v1537_v46 = vpop.f32.mrf.mxu0 }
 0x2bb   :  { %v1570_v42 = vmul.f32 %v1569_v16, %v1537_v46 }
 0x2bc   :  { %v1539_v13 = vpop.f32.mrf.mxu0 }
 0x2bd   :  { %v1571_v56 = vmul.f32 %v1569_v16, %v1539_v13 }
 0x2bf   :  { %1672 = vmatprep.mubr.f32.mxu0 %v1571_v56 }
 0x2c0   :  { %1673 = vmatmul.mubr.f32.vlgmr.msra.gmra.mxu0 %v1570_v42 }
 0x2c1   :  { %1912 = vmatprep.mubr.f32.mxu0 %v2452_v17  ;;  %1877 = vmatpush1.msra.mxu0 %v1843_v1 }
 0x2c2   :  { %1878 = vmatprep.subr.mxu0 %v1842_v3 }
 0x2c3   :  { %1879 = vmatpush1.msra.mxu0 %v1841_v5 }
 0x2c4   :  { %2333 = vmatprep.subr.mxu0 %v3560_v15 }
 0x380   :  { %v2295_v17 = vpop.f32.mrf.mxu0 }
 0x382   :  { %v2296_v51 = vpop.f32.mrf.mxu0 }
 0x383   :  { %v2297_v52 = vadd.f32 %v2296_v51, %v2295_v17 }
 0x385   :  { %v1675_v54 = vadd.f32 %v2297_v52, %v2027_v50 }
 0x387   :  { %2028 = vmatmul.mubr.msk.f32.vlgmr.msra.gmra.mxu1 %vm538_vm3, %v1675_v54 }
 0x388   :  { %2299 = vmatpush3.msra.mxu1 %v3565_v0 }
 0x389   :  { %2300 = vmatprep.subr.mxu1 %v3571_v18 }
 0x38a   :  { %2301 = vmatpush3.msra.mxu1 %v3577_v19 }
 0x38b   :  { %2302 = vmatprep.subr.mxu1 %v3586_v4 }
 0x38c   :  { %2303 = vmatpush3.msra.mxu1 %v3593_v31 }
 0x38d   :  { %2304 = vmatprep.subr.mxu1 %v3599_v22 }
 0x38e   :  { %2305 = vmatpush3.msra.mxu1 %v3608_v23 }
 0x38f   :  { %2306 = vmatprep.subr.mxu1 %v3614_v10 }
 0x390   :  { %2307 = vmatpush3.msra.mxu1 %v3620_v24 }
 0x391   :  { %2308 = vmatprep.subr.mxu1 %v3626_v25 }
 0x392   :  { %2309 = vmatpush3.msra.mxu1 %v3634_v2 }
 0x393   :  { %2310 = vmatprep.subr.mxu1 %v3640_v27 }
 0x394   :  { %2311 = vmatpush3.msra.mxu1 %v3646_v28 }
 0x395   :  { %2312 = vmatprep.subr.mxu1 %v3652_v55 }
 0x396   :  { %2313 = vmatpush3.msra.mxu1 %v3658_v21 }
 0x397   :  { %2314 = vmatprep.subr.mxu1 %v3664_v30 }
 0x398   :  { %2315 = vmatpush3.msra.mxu1 %v3670_v32 }
 0x399   :  { %2316 = vmatprep.subr.mxu1 %v3676_v33 }
 0x39a   :  { %2317 = vmatpush3.msra.mxu1 %v3682_v34 }
 0x39b   :  { %2318 = vmatprep.subr.mxu1 %v3688_v35 }
 0x39c   :  { %2319 = vmatpush3.msra.mxu1 %v3694_v36 }
 0x39d   :  { %2320 = vmatprep.subr.mxu1 %v3700_v38 }
 0x39e   :  { %2321 = vmatpush3.msra.mxu1 %v3706_v39 }
 0x39f   :  { %2322 = vmatprep.subr.mxu1 %v3712_v40 }
 0x3a0   :  { %2323 = vmatpush3.msra.mxu1 %v3718_v41 }
 0x3a1   :  { %2324 = vmatprep.subr.mxu1 %v3726_v43 }
 0x3a2   :  { %2325 = vmatpush3.msra.mxu1 %v3732_v44 }
 0x3a3   :  { %2326 = vmatprep.subr.mxu1 %v3738_v47 }
 0x3a4   :  { %2327 = vmatpush3.msra.mxu1 %v3744_v48 }
 0x3a5   :  { %2328 = vmatprep.subr.mxu1 %v3750_v63 }
 0x3a6   :  { %2329 = vmatpush3.msra.mxu1 %v3755_v26 }
 0x447   :  { %v1752_v14 = vpop.f32.mrf.mxu1 }
 0x448   :  { %v1764_v59 = vmul.f32 %v3774_v6, %v1752_v14 }
 0x449   :  { %v1754_v57 = vpop.f32.mrf.mxu1 }
 0x44a   :  { %v1765_v58 = vmul.f32 %v3774_v6, %v1754_v57 }
 0x44c   :  { %1834 = vmatprep.mubr.f32.mxu1 %v1765_v58 }
 0x44d   :  { %1835 = vmatmul.mubr.f32.vlgmr.msra.gmra.mxu1 %v1764_v59 }
 0x50d   :  { %v2330_v29 = vpop.f32.mrf.mxu1 }
 0x50f   :  { %v2331_v6 = vpop.f32.mrf.mxu1 }
 0x510   :  { %v2332_v8 = vadd.f32 %v2331_v6, %v2330_v29 }
 0x512   :  { %v1837_v53 = vadd.f32 %v2332_v8, %v2029_v61 }
 0x514   :  { %2030 = vmatmul.mubr.msk.f32.vlgmr.msra.gmra.mxu0 %vm538_vm3, %v1837_v53 }
 0x515   :  { %2334 = vmatpush3.msra.mxu0 %v3565_v0 }
 0x516   :  { %2335 = vmatprep.subr.mxu0 %v3571_v18 }
 0x517   :  { %2336 = vmatpush3.msra.mxu0 %v3577_v19 }
 0x518   :  { %2337 = vmatprep.subr.mxu0 %v3586_v4 }
 0x519   :  { %2338 = vmatpush3.msra.mxu0 %v3593_v31  ;;  %v2031_v31 = vld [vmem:[%s3910_s16 + $0x2] ss:$0 sm:$0xff] }
 0x51a   :  { %2339 = vmatprep.subr.mxu0 %v3599_v22 }
 0x51b   :  { %2340 = vmatpush3.msra.mxu0 %v3608_v23 }
 0x51c   :  { %2341 = vmatprep.subr.mxu0 %v3614_v10 }
 0x51d   :  { %2342 = vmatpush3.msra.mxu0 %v3620_v24 }
 0x51e   :  { %2343 = vmatprep.subr.mxu0 %v3626_v25 }
 0x51f   :  { %2344 = vmatpush3.msra.mxu0 %v3634_v2 }
 0x520   :  { %2345 = vmatprep.subr.mxu0 %v3640_v27 }
 0x521   :  { %2346 = vmatpush3.msra.mxu0 %v3646_v28 }
 0x522   :  { %2347 = vmatprep.subr.mxu0 %v3652_v55 }
 0x523   :  { %2348 = vmatpush3.msra.mxu0 %v3658_v21 }
 0x524   :  { %2349 = vmatprep.subr.mxu0 %v3664_v30 }
 0x525   :  { %2350 = vmatpush3.msra.mxu0 %v3670_v32 }
 0x526   :  { %2351 = vmatprep.subr.mxu0 %v3676_v33 }
 0x527   :  { %2352 = vmatpush3.msra.mxu0 %v3682_v34 }
 0x528   :  { %2353 = vmatprep.subr.mxu0 %v3688_v35 }
 0x529   :  { %2354 = vmatpush3.msra.mxu0 %v3694_v36 }
 0x52a   :  { %2355 = vmatprep.subr.mxu0 %v3700_v38 }
 0x52b   :  { %2356 = vmatpush3.msra.mxu0 %v3706_v39 }
 0x52c   :  { %2357 = vmatprep.subr.mxu0 %v3712_v40 }
 0x52d   :  { %2358 = vmatpush3.msra.mxu0 %v3718_v41 }
 0x52e   :  { %2359 = vmatprep.subr.mxu0 %v3726_v43 }
 0x52f   :  { %2360 = vmatpush3.msra.mxu0 %v3732_v44 }
 0x530   :  { %2361 = vmatprep.subr.mxu0 %v3738_v47 }
 0x531   :  { %2362 = vmatpush3.msra.mxu0 %v3744_v48 }
 0x532   :  { %2363 = vmatprep.subr.mxu0 %v3750_v63 }
 0x533   :  { %2364 = vmatpush3.msra.mxu0 %v3755_v26 }
 0x5d4   :  { %v1914_v15 = vpop.f32.mrf.mxu0 }
 0x5d5   :  { %v1926_v19 = vmul.f32 %v3777_v7, %v1914_v15 }
 0x5d6   :  { %v1916_v0 = vpop.f32.mrf.mxu0 }
 0x5d7   :  { %v1927_v18 = vmul.f32 %v3777_v7, %v1916_v0 }
 0x5d9   :  { %1996 = vmatprep.mubr.f32.mxu0 %v1927_v18 }
 0x5da   :  { %1997 = vmatmul.mubr.f32.vlgmr.msra.gmra.mxu0 %v1926_v19 }
 0x69a   :  { %v2365_v4 = vpop.f32.mrf.mxu0 }
 0x69c   :  { %v2366_v22 = vpop.f32.mrf.mxu0 }
 0x69d   :  { %v2367_v23 = vadd.f32 %v2366_v22, %v2365_v4 }
 0x69f   :  { %v1999_v10 = vadd.f32 %v2367_v23, %v2031_v31 }
 0x6a1   :  { %2003 = vst.msk [vmem:[#allocation2] sm:$0x3] %vm2002_vm0, %v1999_v10 }
 0x6a2   :  { %2441 = shalt.err (!%p2438_p4)
}
 0x6a3   :  { %2013 = dma.vmem_to_hbm [thread:$0]  %s2011_s24, 32, %s3911_s17, [#allocation3]  }
 0x6a4   :  { %2450 = dma.done.wait [#allocation3], 32  }
 0x6a5   :  { %2451 = vsyncadd [#allocation3], 4294967264 }
 0x6a6   :  { %2017 = vsyncpa [#allocation3], 1 }

</bundles_post_ra>
